<compile_context>
chip_gen: v7x
topology: tpu7x:2x2x1
jax: 0.10.0
libtpu: 0.0.40
codegen_flags: <defaults>
</compile_context>

<pallas_src>
import jax
import jax.numpy as jnp
from jax.experimental import pallas as pl
from jax.experimental.pallas import tpu as pltpu  # noqa: F401  (kept for TPU backend)

# ---- synthetic (small) encoder config, standing in for AutoModel hidden sizes ----
BATCH      = 2
SEQ        = 8
HIDDEN     = 32
NUM_HEADS  = 2
HEAD_DIM   = HIDDEN // NUM_HEADS
FFN        = 64
NUM_LAYERS = 2
VOCAB      = 128        # synthetic vocab (stands in for tokenizer_size=30523)
NLABELS    = 1          # emotion_nlabels
LN_EPS     = 1e-12
BN_EPS     = 1e-5


# --------------------------- fused Pallas kernel -----------------------------------

def fused_forward_kernel(x_ref, addmask_ref, sel_ref, embg_ref, embb_ref,
                         wq_ref, bq_ref, wk_ref, bk_ref, wv_ref, bv_ref,
                         wo_ref, bo_ref, ln1g_ref, ln1b_ref,
                         w1_ref, b1_ref, w2_ref, b2_ref, ln2g_ref, ln2b_ref,
                         bng_ref, bnb_ref, bnm_ref, bnv_ref, hw_ref, hb_ref,
                         o_ref):
    """Whole EmotionClassifier forward for all B*S packed rows in one invocation."""
    scale = 1.0 / (HEAD_DIM ** 0.5)
    bf16 = jnp.bfloat16

    def _ln(z, g, b):
        mu = jnp.mean(z, axis=-1, keepdims=True)
        var = jnp.mean((z - mu) ** 2, axis=-1, keepdims=True)
        return (z - mu) * jax.lax.rsqrt(var + LN_EPS) * g + b

    # ---- embeddings LayerNorm (embedding gather done as JAX glue in the wrapper) ----
    x = x_ref[...].astype(jnp.float32)                    # (B*S, H), resident the whole kernel
    x = _ln(x, embg_ref[...], embb_ref[...])

    # Packed additive attention mask: block-diagonal (cross-sequence) + key padding.
    addmask = addmask_ref[...]                            # (B*S, B*S), f32, 0 / -1e9

    # ---- encoder layers (static unroll; weights indexed with static layer/head ids) ----
    for l in range(NUM_LAYERS):
        xb = x.astype(bf16)

        attn = jnp.zeros((BATCH * SEQ, HIDDEN), jnp.float32)
        for h in range(NUM_HEADS):
            # per-head projections over ALL rows (weights pre-split per head -> no lane slicing)
            q = (jnp.dot(xb, wq_ref[l, h], preferred_element_type=jnp.float32)
                 + bq_ref[l, h]).astype(bf16)             # (B*S, HD)
            k = (jnp.dot(xb, wk_ref[l, h], preferred_element_type=jnp.float32)
                 + bk_ref[l, h]).astype(bf16)
            v = (jnp.dot(xb, wv_ref[l, h], preferred_element_type=jnp.float32)
                 + bv_ref[l, h]).astype(bf16)

            # packed attention over all sequences at once; mask keeps it block-diagonal
            s = jnp.dot(q, k.T, preferred_element_type=jnp.float32) * scale + addmask
            s = s - jnp.max(s, axis=-1, keepdims=True)    # f32 softmax statistics
            p = jnp.exp(s)
            p = p * pl.reciprocal(jnp.sum(p, axis=-1, keepdims=True), approx=True)

            ctx = jnp.dot(p.astype(bf16), v, preferred_element_type=jnp.float32)  # (B*S, HD)
            attn = attn + jnp.dot(ctx.astype(bf16), wo_ref[l, h],
                                  preferred_element_type=jnp.float32)             # (B*S, H)

        attn = attn + bo_ref[l]                           # output-projection bias added once
        x = _ln(x + attn, ln1g_ref[l], ln1b_ref[l])

        # feed-forward
        ff = jnp.dot(x.astype(bf16), w1_ref[l], preferred_element_type=jnp.float32) + b1_ref[l]
        # TODO(synk): BERT uses erf-GELU; tanh-approx GELU used for this synthetic encoder.
        ff = jax.nn.gelu(ff, approximate=True)
        ff = jnp.dot(ff.astype(bf16), w2_ref[l], preferred_element_type=jnp.float32) + b2_ref[l]

        x = _ln(x + ff, ln2g_ref[l], ln2b_ref[l])

    # ---- CLS pooling: tiny selection matmul picks row b*SEQ for each sequence ----
    cls = jnp.dot(sel_ref[...], x, preferred_element_type=jnp.float32)   # (B, H)

    # ---- classifier head: BatchNorm1d (running stats) + Dropout(eval=identity) + Linear ----
    xhat = (cls - bnm_ref[...]) * jax.lax.rsqrt(bnv_ref[...] + BN_EPS)
    y = xhat * bng_ref[...] + bnb_ref[...]
    # NLABELS == 1: logit as a VPU multiply-reduce instead of an N=1 MXU matmul.
    logits = jnp.sum(y * hw_ref[...], axis=-1, keepdims=True) + hb_ref[...]
    o_ref[...] = logits.astype(o_ref.dtype)


# --------------------------- parameters & forward -----------------------------------

def init_params(key):
    def norm(k, shape, std=0.02):
        return jax.random.normal(k, shape, jnp.float32) * std

    keys = iter(jax.random.split(key, 8 * NUM_LAYERS + 8))
    p = {}
    p["word_emb"] = norm(next(keys), (VOCAB, HIDDEN))
    p["pos_emb"]  = norm(next(keys), (SEQ, HIDDEN))
    p["type_emb"] = norm(next(keys), (2, HIDDEN))
    p["emb_ln_g"] = jnp.ones((1, HIDDEN), jnp.float32)
    p["emb_ln_b"] = jnp.zeros((1, HIDDEN), jnp.float32)

    def split_out_cols(w):   # (H, H) -> (NH, H, HD): per-head output-column slices
        return jnp.transpose(w.reshape(HIDDEN, NUM_HEADS, HEAD_DIM), (1, 0, 2))

    wq, wk, wv, wo, w1, w2 = [], [], [], [], [], []
    for _ in range(NUM_LAYERS):
        wq.append(split_out_cols(norm(next(keys), (HIDDEN, HIDDEN))))
        wk.append(split_out_cols(norm(next(keys), (HIDDEN, HIDDEN))))
        wv.append(split_out_cols(norm(next(keys), (HIDDEN, HIDDEN))))
        wo.append(norm(next(keys), (HIDDEN, HIDDEN)).reshape(NUM_HEADS, HEAD_DIM, HIDDEN))
        w1.append(norm(next(keys), (HIDDEN, FFN)))
        w2.append(norm(next(keys), (FFN, HIDDEN)))

    bf16 = jnp.bfloat16
    p["wq"] = jnp.stack(wq).astype(bf16)          # (L, NH, H, HD)
    p["wk"] = jnp.stack(wk).astype(bf16)
    p["wv"] = jnp.stack(wv).astype(bf16)
    p["wo"] = jnp.stack(wo).astype(bf16)          # (L, NH, HD, H)
    p["w1"] = jnp.stack(w1).astype(bf16)          # (L, H, FFN)
    p["w2"] = jnp.stack(w2).astype(bf16)          # (L, FFN, H)

    zeros_h = jnp.zeros((NUM_LAYERS, 1, HIDDEN), jnp.float32)
    ones_h  = jnp.ones((NUM_LAYERS, 1, HIDDEN), jnp.float32)
    p["bq"] = jnp.zeros((NUM_LAYERS, NUM_HEADS, 1, HEAD_DIM), jnp.float32)
    p["bk"] = jnp.zeros_like(p["bq"])
    p["bv"] = jnp.zeros_like(p["bq"])
    p["bo"] = zeros_h
    p["ln1_g"], p["ln1_b"] = ones_h, zeros_h
    p["b1"] = jnp.zeros((NUM_LAYERS, 1, FFN), jnp.float32)
    p["b2"] = zeros_h
    p["ln2_g"], p["ln2_b"] = ones_h, zeros_h

    # classifier head: BatchNorm1d(H) defaults + xavier_uniform_ Linear weight (init_weights)
    p["bn_g"] = jnp.ones((1, HIDDEN), jnp.float32)
    p["bn_b"] = jnp.zeros((1, HIDDEN), jnp.float32)
    p["bn_m"] = jnp.zeros((1, HIDDEN), jnp.float32)
    p["bn_v"] = jnp.ones((1, HIDDEN), jnp.float32)
    limit = (6.0 / (HIDDEN + NLABELS)) ** 0.5
    p["head_w"] = jax.random.uniform(next(keys), (NLABELS, HIDDEN), jnp.float32,
                                     minval=-limit, maxval=limit)   # (1, H) for VPU reduce
    p["head_b"] = jnp.zeros((1, NLABELS), jnp.float32)
    return p


def emotion_classifier_forward(params, input_ids, attention_mask, token_type_ids):
    B, S = input_ids.shape

    # --- encoder embeddings (gather = JAX glue, not a kernel) ---
    x = (params["word_emb"][input_ids]
         + params["pos_emb"][None, :, :]
         + params["type_emb"][token_type_ids])            # (B, S, H) f32
    x2 = x.reshape(B * S, HIDDEN)

    # Packed-sequence additive mask (built ONCE here, reused by every layer in-kernel):
    # query i may attend to key j iff they belong to the same sequence and key j is not padding.
    batch_ids = jnp.repeat(jnp.arange(B), S)
    key_valid = attention_mask.reshape(B * S) > 0
    visible = (batch_ids[:, None] == batch_ids[None, :]) & key_valid[None, :]
    addmask = jnp.where(visible, 0.0, -1e9).astype(jnp.float32)      # (B*S, B*S)

    # CLS-row selection matrix: row b picks packed row b*S  (last_hidden_state[:, 0]).
    cls_sel = jnp.zeros((B, B * S), jnp.float32).at[jnp.arange(B), jnp.arange(B) * S].set(1.0)

    return pl.pallas_call(
        fused_forward_kernel,
        out_shape=jax.ShapeDtypeStruct((B, NLABELS), jnp.float32),
        # no grid / no BlockSpecs: single invocation, every (tiny) operand whole in VMEM
    )(x2, addmask, cls_sel,
      params["emb_ln_g"], params["emb_ln_b"],
      params["wq"], params["bq"], params["wk"], params["bk"],
      params["wv"], params["bv"], params["wo"], params["bo"],
      params["ln1_g"], params["ln1_b"],
      params["w1"], params["b1"], params["w2"], params["b2"],
      params["ln2_g"], params["ln2_b"],
      params["bn_g"], params["bn_b"], params["bn_m"], params["bn_v"],
      params["head_w"], params["head_b"])


if __name__ == "__main__":
    key = jax.random.PRNGKey(0)
    pkey, dkey = jax.random.split(key)
    params = init_params(pkey)

    input_ids = jax.random.randint(dkey, (BATCH, SEQ), 0, VOCAB, dtype=jnp.int32)
    attention_mask = jnp.ones((BATCH, SEQ), dtype=jnp.int32).at[1, 6:].set(0)  # pad tail of 2nd seq
    token_type_ids = jnp.zeros((BATCH, SEQ), dtype=jnp.int32)

    fwd = jax.jit(emotion_classifier_forward)
    out = jax.block_until_ready(fwd(params, input_ids, attention_mask, token_type_ids))

    assert out.shape == (BATCH, NLABELS) and out.dtype == jnp.float32
    assert bool(jnp.all(jnp.isfinite(out)))
    print("KERNEL_OK")
</pallas_src>

<mosaic_0001>
module attributes {stable_mosaic.version = 11 : i64} {
  func.func @fused_forward_kernel(%arg0: memref<16x32xf32, #tpu.memory_space<vmem>>, %arg1: memref<16x16xf32, #tpu.memory_space<vmem>>, %arg2: memref<2x16xf32, #tpu.memory_space<vmem>>, %arg3: memref<1x32xf32, #tpu.memory_space<vmem>>, %arg4: memref<1x32xf32, #tpu.memory_space<vmem>>, %arg5: memref<2x2x32x16xbf16, #tpu.memory_space<vmem>>, %arg6: memref<2x2x1x16xf32, #tpu.memory_space<vmem>>, %arg7: memref<2x2x32x16xbf16, #tpu.memory_space<vmem>>, %arg8: memref<2x2x1x16xf32, #tpu.memory_space<vmem>>, %arg9: memref<2x2x32x16xbf16, #tpu.memory_space<vmem>>, %arg10: memref<2x2x1x16xf32, #tpu.memory_space<vmem>>, %arg11: memref<2x2x16x32xbf16, #tpu.memory_space<vmem>>, %arg12: memref<2x1x32xf32, #tpu.memory_space<vmem>>, %arg13: memref<2x1x32xf32, #tpu.memory_space<vmem>>, %arg14: memref<2x1x32xf32, #tpu.memory_space<vmem>>, %arg15: memref<2x32x64xbf16, #tpu.memory_space<vmem>>, %arg16: memref<2x1x64xf32, #tpu.memory_space<vmem>>, %arg17: memref<2x64x32xbf16, #tpu.memory_space<vmem>>, %arg18: memref<2x1x32xf32, #tpu.memory_space<vmem>>, %arg19: memref<2x1x32xf32, #tpu.memory_space<vmem>>, %arg20: memref<2x1x32xf32, #tpu.memory_space<vmem>>, %arg21: memref<1x32xf32, #tpu.memory_space<vmem>>, %arg22: memref<1x32xf32, #tpu.memory_space<vmem>>, %arg23: memref<1x32xf32, #tpu.memory_space<vmem>>, %arg24: memref<1x32xf32, #tpu.memory_space<vmem>>, %arg25: memref<1x32xf32, #tpu.memory_space<vmem>>, %arg26: memref<1x1xf32, #tpu.memory_space<vmem>>, %arg27: memref<2x1xf32, #tpu.memory_space<vmem>>) attributes {dimension_semantics = [], scalar_prefetch = 0 : i64, scratch_operands = 0 : i64, tpu.core_type = #tpu.core_type<tc>} {
    %c0 = arith.constant 0 : index
    %c0_0 = arith.constant 0 : index
    %0 = vector.load %arg0[%c0, %c0_0] : memref<16x32xf32, #tpu.memory_space<vmem>>, vector<16x32xf32>
    %c0_1 = arith.constant 0 : index
    %c0_2 = arith.constant 0 : index
    %1 = vector.load %arg3[%c0_1, %c0_2] : memref<1x32xf32, #tpu.memory_space<vmem>>, vector<1x32xf32>
    %c0_3 = arith.constant 0 : index
    %c0_4 = arith.constant 0 : index
    %2 = vector.load %arg4[%c0_3, %c0_4] : memref<1x32xf32, #tpu.memory_space<vmem>>, vector<1x32xf32>
    %cst = arith.constant dense<0.000000e+00> : vector<16xf32>
    %3 = vector.multi_reduction <add>, %0, %cst [1] : vector<16x32xf32> to vector<16xf32>
    %4 = vector.shape_cast %3 : vector<16xf32> to vector<16x1xf32>
    %cst_5 = arith.constant 3.200000e+01 : f32
    %5 = vector.broadcast %cst_5 : f32 to vector<16x1xf32>
    %6 = arith.divf %4, %5 : vector<16x1xf32>
    %7 = vector.broadcast %6 : vector<16x1xf32> to vector<16x32xf32>
    %8 = arith.subf %0, %7 : vector<16x32xf32>
    %9 = arith.mulf %8, %8 : vector<16x32xf32>
    %cst_6 = arith.constant dense<0.000000e+00> : vector<16xf32>
    %10 = vector.multi_reduction <add>, %9, %cst_6 [1] : vector<16x32xf32> to vector<16xf32>
    %11 = vector.shape_cast %10 : vector<16xf32> to vector<16x1xf32>
    %cst_7 = arith.constant 3.200000e+01 : f32
    %12 = vector.broadcast %cst_7 : f32 to vector<16x1xf32>
    %13 = arith.divf %11, %12 : vector<16x1xf32>
    %14 = vector.broadcast %6 : vector<16x1xf32> to vector<16x32xf32>
    %15 = arith.subf %0, %14 : vector<16x32xf32>
    %cst_8 = arith.constant 9.99999996E-13 : f32
    %16 = vector.broadcast %cst_8 : f32 to vector<16x1xf32>
    %17 = arith.addf %13, %16 : vector<16x1xf32>
    %18 = math.rsqrt %17 : vector<16x1xf32>
    %19 = vector.broadcast %18 : vector<16x1xf32> to vector<16x32xf32>
    %20 = arith.mulf %15, %19 : vector<16x32xf32>
    %21 = vector.broadcast %1 : vector<1x32xf32> to vector<16x32xf32>
    %22 = arith.mulf %20, %21 : vector<16x32xf32>
    %23 = vector.broadcast %2 : vector<1x32xf32> to vector<16x32xf32>
    %24 = arith.addf %22, %23 : vector<16x32xf32>
    %c0_9 = arith.constant 0 : index
    %c0_10 = arith.constant 0 : index
    %25 = vector.load %arg1[%c0_9, %c0_10] : memref<16x16xf32, #tpu.memory_space<vmem>>, vector<16x16xf32>
    %26 = arith.truncf %24 : vector<16x32xf32> to vector<16x32xbf16>
    %cst_11 = arith.constant 0.000000e+00 : f32
    %27 = vector.broadcast %cst_11 : f32 to vector<16x32xf32>
    %c0_12 = arith.constant 0 : index
    %c0_13 = arith.constant 0 : index
    %c0_14 = arith.constant 0 : index
    %c0_15 = arith.constant 0 : index
    %28 = vector.load %arg5[%c0_12, %c0_13, %c0_14, %c0_15] : memref<2x2x32x16xbf16, #tpu.memory_space<vmem>>, vector<1x1x32x16xbf16>
    %29 = vector.shape_cast %28 : vector<1x1x32x16xbf16> to vector<32x16xbf16>
    %cst_16 = arith.constant dense<0.000000e+00> : vector<16x16xf32>
    %30 = tpu.matmul %26, %29, %cst_16 {dimension_numbers = #tpu.dot_dimension_numbers<[1], [0], [0], [1], [0, 0, 1, 1], [], []>} : vector<16x32xbf16>, vector<32x16xbf16>, vector<16x16xf32> -> vector<16x16xf32>
    %c0_17 = arith.constant 0 : index
    %c0_18 = arith.constant 0 : index
    %c0_19 = arith.constant 0 : index
    %c0_20 = arith.constant 0 : index
    %31 = vector.load %arg6[%c0_17, %c0_18, %c0_19, %c0_20] : memref<2x2x1x16xf32, #tpu.memory_space<vmem>>, vector<1x1x1x16xf32>
    %32 = vector.shape_cast %31 : vector<1x1x1x16xf32> to vector<1x16xf32>
    %33 = vector.broadcast %32 : vector<1x16xf32> to vector<16x16xf32>
    %34 = arith.addf %30, %33 : vector<16x16xf32>
    %35 = arith.truncf %34 : vector<16x16xf32> to vector<16x16xbf16>
    %c0_21 = arith.constant 0 : index
    %c0_22 = arith.constant 0 : index
    %c0_23 = arith.constant 0 : index
    %c0_24 = arith.constant 0 : index
    %36 = vector.load %arg7[%c0_21, %c0_22, %c0_23, %c0_24] : memref<2x2x32x16xbf16, #tpu.memory_space<vmem>>, vector<1x1x32x16xbf16>
    %37 = vector.shape_cast %36 : vector<1x1x32x16xbf16> to vector<32x16xbf16>
    %cst_25 = arith.constant dense<0.000000e+00> : vector<16x16xf32>
    %38 = tpu.matmul %26, %37, %cst_25 {dimension_numbers = #tpu.dot_dimension_numbers<[1], [0], [0], [1], [0, 0, 1, 1], [], []>} : vector<16x32xbf16>, vector<32x16xbf16>, vector<16x16xf32> -> vector<16x16xf32>
    %c0_26 = arith.constant 0 : index
    %c0_27 = arith.constant 0 : index
    %c0_28 = arith.constant 0 : index
    %c0_29 = arith.constant 0 : index
    %39 = vector.load %arg8[%c0_26, %c0_27, %c0_28, %c0_29] : memref<2x2x1x16xf32, #tpu.memory_space<vmem>>, vector<1x1x1x16xf32>
    %40 = vector.shape_cast %39 : vector<1x1x1x16xf32> to vector<1x16xf32>
    %41 = vector.broadcast %40 : vector<1x16xf32> to vector<16x16xf32>
    %42 = arith.addf %38, %41 : vector<16x16xf32>
    %43 = arith.truncf %42 : vector<16x16xf32> to vector<16x16xbf16>
    %c0_30 = arith.constant 0 : index
    %c0_31 = arith.constant 0 : index
    %c0_32 = arith.constant 0 : index
    %c0_33 = arith.constant 0 : index
    %44 = vector.load %arg9[%c0_30, %c0_31, %c0_32, %c0_33] : memref<2x2x32x16xbf16, #tpu.memory_space<vmem>>, vector<1x1x32x16xbf16>
    %45 = vector.shape_cast %44 : vector<1x1x32x16xbf16> to vector<32x16xbf16>
    %cst_34 = arith.constant dense<0.000000e+00> : vector<16x16xf32>
    %46 = tpu.matmul %26, %45, %cst_34 {dimension_numbers = #tpu.dot_dimension_numbers<[1], [0], [0], [1], [0, 0, 1, 1], [], []>} : vector<16x32xbf16>, vector<32x16xbf16>, vector<16x16xf32> -> vector<16x16xf32>
    %c0_35 = arith.constant 0 : index
    %c0_36 = arith.constant 0 : index
    %c0_37 = arith.constant 0 : index
    %c0_38 = arith.constant 0 : index
    %47 = vector.load %arg10[%c0_35, %c0_36, %c0_37, %c0_38] : memref<2x2x1x16xf32, #tpu.memory_space<vmem>>, vector<1x1x1x16xf32>
    %48 = vector.shape_cast %47 : vector<1x1x1x16xf32> to vector<1x16xf32>
    %49 = vector.broadcast %48 : vector<1x16xf32> to vector<16x16xf32>
    %50 = arith.addf %46, %49 : vector<16x16xf32>
    %51 = arith.truncf %50 : vector<16x16xf32> to vector<16x16xbf16>
    %52 = tpu.transpose %43, [1, 0] : vector<16x16xbf16> -> vector<16x16xbf16>
    %cst_39 = arith.constant dense<0.000000e+00> : vector<16x16xf32>
    %53 = tpu.matmul %35, %52, %cst_39 {dimension_numbers = #tpu.dot_dimension_numbers<[1], [0], [0], [1], [0, 0, 1, 1], [], []>} : vector<16x16xbf16>, vector<16x16xbf16>, vector<16x16xf32> -> vector<16x16xf32>
    %cst_40 = arith.constant 2.500000e-01 : f32
    %54 = vector.broadcast %cst_40 : f32 to vector<16x16xf32>
    %55 = arith.mulf %53, %54 : vector<16x16xf32>
    %56 = arith.addf %55, %25 : vector<16x16xf32>
    %cst_41 = arith.constant dense<0xFF800000> : vector<16xf32>
    %57 = vector.multi_reduction <maximumf>, %56, %cst_41 [1] : vector<16x16xf32> to vector<16xf32>
    %58 = vector.shape_cast %57 : vector<16xf32> to vector<16x1xf32>
    %59 = vector.broadcast %58 : vector<16x1xf32> to vector<16x16xf32>
    %60 = arith.subf %56, %59 : vector<16x16xf32>
    %61 = math.exp %60 : vector<16x16xf32>
    %cst_42 = arith.constant dense<0.000000e+00> : vector<16xf32>
    %62 = vector.multi_reduction <add>, %61, %cst_42 [1] : vector<16x16xf32> to vector<16xf32>
    %63 = vector.shape_cast %62 : vector<16xf32> to vector<16x1xf32>
    %64 = tpu.reciprocal %63 {approx = true} : vector<16x1xf32> -> vector<16x1xf32>
    %65 = vector.broadcast %64 : vector<16x1xf32> to vector<16x16xf32>
    %66 = arith.mulf %61, %65 : vector<16x16xf32>
    %67 = arith.truncf %66 : vector<16x16xf32> to vector<16x16xbf16>
    %cst_43 = arith.constant dense<0.000000e+00> : vector<16x16xf32>
    %68 = tpu.matmul %67, %51, %cst_43 {dimension_numbers = #tpu.dot_dimension_numbers<[1], [0], [0], [1], [0, 0, 1, 1], [], []>} : vector<16x16xbf16>, vector<16x16xbf16>, vector<16x16xf32> -> vector<16x16xf32>
    %69 = arith.truncf %68 : vector<16x16xf32> to vector<16x16xbf16>
    %c0_44 = arith.constant 0 : index
    %c0_45 = arith.constant 0 : index
    %c0_46 = arith.constant 0 : index
    %c0_47 = arith.constant 0 : index
    %70 = vector.load %arg11[%c0_44, %c0_45, %c0_46, %c0_47] : memref<2x2x16x32xbf16, #tpu.memory_space<vmem>>, vector<1x1x16x32xbf16>
    %71 = vector.shape_cast %70 : vector<1x1x16x32xbf16> to vector<16x32xbf16>
    %cst_48 = arith.constant dense<0.000000e+00> : vector<16x32xf32>
    %72 = tpu.matmul %69, %71, %cst_48 {dimension_numbers = #tpu.dot_dimension_numbers<[1], [0], [0], [1], [0, 0, 1, 1], [], []>} : vector<16x16xbf16>, vector<16x32xbf16>, vector<16x32xf32> -> vector<16x32xf32>
    %73 = arith.addf %27, %72 : vector<16x32xf32>
    %c0_49 = arith.constant 0 : index
    %c1 = arith.constant 1 : index
    %c0_50 = arith.constant 0 : index
    %c0_51 = arith.constant 0 : index
    %74 = vector.load %arg5[%c0_49, %c1, %c0_50, %c0_51] : memref<2x2x32x16xbf16, #tpu.memory_space<vmem>>, vector<1x1x32x16xbf16>
    %75 = vector.shape_cast %74 : vector<1x1x32x16xbf16> to vector<32x16xbf16>
    %cst_52 = arith.constant dense<0.000000e+00> : vector<16x16xf32>
    %76 = tpu.matmul %26, %75, %cst_52 {dimension_numbers = #tpu.dot_dimension_numbers<[1], [0], [0], [1], [0, 0, 1, 1], [], []>} : vector<16x32xbf16>, vector<32x16xbf16>, vector<16x16xf32> -> vector<16x16xf32>
    %c0_53 = arith.constant 0 : index
    %c1_54 = arith.constant 1 : index
    %c0_55 = arith.constant 0 : index
    %c0_56 = arith.constant 0 : index
    %77 = vector.load %arg6[%c0_53, %c1_54, %c0_55, %c0_56] : memref<2x2x1x16xf32, #tpu.memory_space<vmem>>, vector<1x1x1x16xf32>
    %78 = vector.shape_cast %77 : vector<1x1x1x16xf32> to vector<1x16xf32>
    %79 = vector.broadcast %78 : vector<1x16xf32> to vector<16x16xf32>
    %80 = arith.addf %76, %79 : vector<16x16xf32>
    %81 = arith.truncf %80 : vector<16x16xf32> to vector<16x16xbf16>
    %c0_57 = arith.constant 0 : index
    %c1_58 = arith.constant 1 : index
    %c0_59 = arith.constant 0 : index
    %c0_60 = arith.constant 0 : index
    %82 = vector.load %arg7[%c0_57, %c1_58, %c0_59, %c0_60] : memref<2x2x32x16xbf16, #tpu.memory_space<vmem>>, vector<1x1x32x16xbf16>
    %83 = vector.shape_cast %82 : vector<1x1x32x16xbf16> to vector<32x16xbf16>
    %cst_61 = arith.constant dense<0.000000e+00> : vector<16x16xf32>
    %84 = tpu.matmul %26, %83, %cst_61 {dimension_numbers = #tpu.dot_dimension_numbers<[1], [0], [0], [1], [0, 0, 1, 1], [], []>} : vector<16x32xbf16>, vector<32x16xbf16>, vector<16x16xf32> -> vector<16x16xf32>
    %c0_62 = arith.constant 0 : index
    %c1_63 = arith.constant 1 : index
    %c0_64 = arith.constant 0 : index
    %c0_65 = arith.constant 0 : index
    %85 = vector.load %arg8[%c0_62, %c1_63, %c0_64, %c0_65] : memref<2x2x1x16xf32, #tpu.memory_space<vmem>>, vector<1x1x1x16xf32>
    %86 = vector.shape_cast %85 : vector<1x1x1x16xf32> to vector<1x16xf32>
    %87 = vector.broadcast %86 : vector<1x16xf32> to vector<16x16xf32>
    %88 = arith.addf %84, %87 : vector<16x16xf32>
    %89 = arith.truncf %88 : vector<16x16xf32> to vector<16x16xbf16>
    %c0_66 = arith.constant 0 : index
    %c1_67 = arith.constant 1 : index
    %c0_68 = arith.constant 0 : index
    %c0_69 = arith.constant 0 : index
    %90 = vector.load %arg9[%c0_66, %c1_67, %c0_68, %c0_69] : memref<2x2x32x16xbf16, #tpu.memory_space<vmem>>, vector<1x1x32x16xbf16>
    %91 = vector.shape_cast %90 : vector<1x1x32x16xbf16> to vector<32x16xbf16>
    %cst_70 = arith.constant dense<0.000000e+00> : vector<16x16xf32>
    %92 = tpu.matmul %26, %91, %cst_70 {dimension_numbers = #tpu.dot_dimension_numbers<[1], [0], [0], [1], [0, 0, 1, 1], [], []>} : vector<16x32xbf16>, vector<32x16xbf16>, vector<16x16xf32> -> vector<16x16xf32>
    %c0_71 = arith.constant 0 : index
    %c1_72 = arith.constant 1 : index
    %c0_73 = arith.constant 0 : index
    %c0_74 = arith.constant 0 : index
    %93 = vector.load %arg10[%c0_71, %c1_72, %c0_73, %c0_74] : memref<2x2x1x16xf32, #tpu.memory_space<vmem>>, vector<1x1x1x16xf32>
    %94 = vector.shape_cast %93 : vector<1x1x1x16xf32> to vector<1x16xf32>
    %95 = vector.broadcast %94 : vector<1x16xf32> to vector<16x16xf32>
    %96 = arith.addf %92, %95 : vector<16x16xf32>
    %97 = arith.truncf %96 : vector<16x16xf32> to vector<16x16xbf16>
    %98 = tpu.transpose %89, [1, 0] : vector<16x16xbf16> -> vector<16x16xbf16>
    %cst_75 = arith.constant dense<0.000000e+00> : vector<16x16xf32>
    %99 = tpu.matmul %81, %98, %cst_75 {dimension_numbers = #tpu.dot_dimension_numbers<[1], [0], [0], [1], [0, 0, 1, 1], [], []>} : vector<16x16xbf16>, vector<16x16xbf16>, vector<16x16xf32> -> vector<16x16xf32>
    %cst_76 = arith.constant 2.500000e-01 : f32
    %100 = vector.broadcast %cst_76 : f32 to vector<16x16xf32>
    %101 = arith.mulf %99, %100 : vector<16x16xf32>
    %102 = arith.addf %101, %25 : vector<16x16xf32>
    %cst_77 = arith.constant dense<0xFF800000> : vector<16xf32>
    %103 = vector.multi_reduction <maximumf>, %102, %cst_77 [1] : vector<16x16xf32> to vector<16xf32>
    %104 = vector.shape_cast %103 : vector<16xf32> to vector<16x1xf32>
    %105 = vector.broadcast %104 : vector<16x1xf32> to vector<16x16xf32>
    %106 = arith.subf %102, %105 : vector<16x16xf32>
    %107 = math.exp %106 : vector<16x16xf32>
    %cst_78 = arith.constant dense<0.000000e+00> : vector<16xf32>
    %108 = vector.multi_reduction <add>, %107, %cst_78 [1] : vector<16x16xf32> to vector<16xf32>
    %109 = vector.shape_cast %108 : vector<16xf32> to vector<16x1xf32>
    %110 = tpu.reciprocal %109 {approx = true} : vector<16x1xf32> -> vector<16x1xf32>
    %111 = vector.broadcast %110 : vector<16x1xf32> to vector<16x16xf32>
    %112 = arith.mulf %107, %111 : vector<16x16xf32>
    %113 = arith.truncf %112 : vector<16x16xf32> to vector<16x16xbf16>
    %cst_79 = arith.constant dense<0.000000e+00> : vector<16x16xf32>
    %114 = tpu.matmul %113, %97, %cst_79 {dimension_numbers = #tpu.dot_dimension_numbers<[1], [0], [0], [1], [0, 0, 1, 1], [], []>} : vector<16x16xbf16>, vector<16x16xbf16>, vector<16x16xf32> -> vector<16x16xf32>
    %115 = arith.truncf %114 : vector<16x16xf32> to vector<16x16xbf16>
    %c0_80 = arith.constant 0 : index
    %c1_81 = arith.constant 1 : index
    %c0_82 = arith.constant 0 : index
    %c0_83 = arith.constant 0 : index
    %116 = vector.load %arg11[%c0_80, %c1_81, %c0_82, %c0_83] : memref<2x2x16x32xbf16, #tpu.memory_space<vmem>>, vector<1x1x16x32xbf16>
    %117 = vector.shape_cast %116 : vector<1x1x16x32xbf16> to vector<16x32xbf16>
    %cst_84 = arith.constant dense<0.000000e+00> : vector<16x32xf32>
    %118 = tpu.matmul %115, %117, %cst_84 {dimension_numbers = #tpu.dot_dimension_numbers<[1], [0], [0], [1], [0, 0, 1, 1], [], []>} : vector<16x16xbf16>, vector<16x32xbf16>, vector<16x32xf32> -> vector<16x32xf32>
    %119 = arith.addf %73, %118 : vector<16x32xf32>
    %c0_85 = arith.constant 0 : index
    %c0_86 = arith.constant 0 : index
    %c0_87 = arith.constant 0 : index
    %120 = vector.load %arg12[%c0_85, %c0_86, %c0_87] : memref<2x1x32xf32, #tpu.memory_space<vmem>>, vector<1x1x32xf32>
    %121 = vector.shape_cast %120 : vector<1x1x32xf32> to vector<1x32xf32>
    %122 = vector.broadcast %121 : vector<1x32xf32> to vector<16x32xf32>
    %123 = arith.addf %119, %122 : vector<16x32xf32>
    %124 = arith.addf %24, %123 : vector<16x32xf32>
    %c0_88 = arith.constant 0 : index
    %c0_89 = arith.constant 0 : index
    %c0_90 = arith.constant 0 : index
    %125 = vector.load %arg13[%c0_88, %c0_89, %c0_90] : memref<2x1x32xf32, #tpu.memory_space<vmem>>, vector<1x1x32xf32>
    %126 = vector.shape_cast %125 : vector<1x1x32xf32> to vector<1x32xf32>
    %c0_91 = arith.constant 0 : index
    %c0_92 = arith.constant 0 : index
    %c0_93 = arith.constant 0 : index
    %127 = vector.load %arg14[%c0_91, %c0_92, %c0_93] : memref<2x1x32xf32, #tpu.memory_space<vmem>>, vector<1x1x32xf32>
    %128 = vector.shape_cast %127 : vector<1x1x32xf32> to vector<1x32xf32>
    %cst_94 = arith.constant dense<0.000000e+00> : vector<16xf32>
    %129 = vector.multi_reduction <add>, %124, %cst_94 [1] : vector<16x32xf32> to vector<16xf32>
    %130 = vector.shape_cast %129 : vector<16xf32> to vector<16x1xf32>
    %cst_95 = arith.constant 3.200000e+01 : f32
    %131 = vector.broadcast %cst_95 : f32 to vector<16x1xf32>
    %132 = arith.divf %130, %131 : vector<16x1xf32>
    %133 = vector.broadcast %132 : vector<16x1xf32> to vector<16x32xf32>
    %134 = arith.subf %124, %133 : vector<16x32xf32>
    %135 = arith.mulf %134, %134 : vector<16x32xf32>
    %cst_96 = arith.constant dense<0.000000e+00> : vector<16xf32>
    %136 = vector.multi_reduction <add>, %135, %cst_96 [1] : vector<16x32xf32> to vector<16xf32>
    %137 = vector.shape_cast %136 : vector<16xf32> to vector<16x1xf32>
    %cst_97 = arith.constant 3.200000e+01 : f32
    %138 = vector.broadcast %cst_97 : f32 to vector<16x1xf32>
    %139 = arith.divf %137, %138 : vector<16x1xf32>
    %140 = vector.broadcast %132 : vector<16x1xf32> to vector<16x32xf32>
    %141 = arith.subf %124, %140 : vector<16x32xf32>
    %cst_98 = arith.constant 9.99999996E-13 : f32
    %142 = vector.broadcast %cst_98 : f32 to vector<16x1xf32>
    %143 = arith.addf %139, %142 : vector<16x1xf32>
    %144 = math.rsqrt %143 : vector<16x1xf32>
    %145 = vector.broadcast %144 : vector<16x1xf32> to vector<16x32xf32>
    %146 = arith.mulf %141, %145 : vector<16x32xf32>
    %147 = vector.broadcast %126 : vector<1x32xf32> to vector<16x32xf32>
    %148 = arith.mulf %146, %147 : vector<16x32xf32>
    %149 = vector.broadcast %128 : vector<1x32xf32> to vector<16x32xf32>
    %150 = arith.addf %148, %149 : vector<16x32xf32>
    %151 = arith.truncf %150 : vector<16x32xf32> to vector<16x32xbf16>
    %c0_99 = arith.constant 0 : index
    %c0_100 = arith.constant 0 : index
    %c0_101 = arith.constant 0 : index
    %152 = vector.load %arg15[%c0_99, %c0_100, %c0_101] : memref<2x32x64xbf16, #tpu.memory_space<vmem>>, vector<1x32x64xbf16>
    %153 = vector.shape_cast %152 : vector<1x32x64xbf16> to vector<32x64xbf16>
    %cst_102 = arith.constant dense<0.000000e+00> : vector<16x64xf32>
    %154 = tpu.matmul %151, %153, %cst_102 {dimension_numbers = #tpu.dot_dimension_numbers<[1], [0], [0], [1], [0, 0, 1, 1], [], []>} : vector<16x32xbf16>, vector<32x64xbf16>, vector<16x64xf32> -> vector<16x64xf32>
    %c0_103 = arith.constant 0 : index
    %c0_104 = arith.constant 0 : index
    %c0_105 = arith.constant 0 : index
    %155 = vector.load %arg16[%c0_103, %c0_104, %c0_105] : memref<2x1x64xf32, #tpu.memory_space<vmem>>, vector<1x1x64xf32>
    %156 = vector.shape_cast %155 : vector<1x1x64xf32> to vector<1x64xf32>
    %157 = vector.broadcast %156 : vector<1x64xf32> to vector<16x64xf32>
    %158 = arith.addf %154, %157 : vector<16x64xf32>
    %159 = arith.mulf %158, %158 : vector<16x64xf32>
    %160 = arith.mulf %158, %159 : vector<16x64xf32>
    %cst_106 = arith.constant 4.471500e-02 : f32
    %161 = vector.broadcast %cst_106 : f32 to vector<16x64xf32>
    %162 = arith.mulf %161, %160 : vector<16x64xf32>
    %163 = arith.addf %158, %162 : vector<16x64xf32>
    %cst_107 = arith.constant 0.797884583 : f32
    %164 = vector.broadcast %cst_107 : f32 to vector<16x64xf32>
    %165 = arith.mulf %164, %163 : vector<16x64xf32>
    %166 = math.tanh %165 : vector<16x64xf32>
    %cst_108 = arith.constant 1.000000e+00 : f32
    %167 = vector.broadcast %cst_108 : f32 to vector<16x64xf32>
    %168 = arith.addf %167, %166 : vector<16x64xf32>
    %cst_109 = arith.constant 5.000000e-01 : f32
    %169 = vector.broadcast %cst_109 : f32 to vector<16x64xf32>
    %170 = arith.mulf %169, %168 : vector<16x64xf32>
    %171 = arith.mulf %158, %170 : vector<16x64xf32>
    %172 = arith.truncf %171 : vector<16x64xf32> to vector<16x64xbf16>
    %c0_110 = arith.constant 0 : index
    %c0_111 = arith.constant 0 : index
    %c0_112 = arith.constant 0 : index
    %173 = vector.load %arg17[%c0_110, %c0_111, %c0_112] : memref<2x64x32xbf16, #tpu.memory_space<vmem>>, vector<1x64x32xbf16>
    %174 = vector.shape_cast %173 : vector<1x64x32xbf16> to vector<64x32xbf16>
    %cst_113 = arith.constant dense<0.000000e+00> : vector<16x32xf32>
    %175 = tpu.matmul %172, %174, %cst_113 {dimension_numbers = #tpu.dot_dimension_numbers<[1], [0], [0], [1], [0, 0, 1, 1], [], []>} : vector<16x64xbf16>, vector<64x32xbf16>, vector<16x32xf32> -> vector<16x32xf32>
    %c0_114 = arith.constant 0 : index
    %c0_115 = arith.constant 0 : index
    %c0_116 = arith.constant 0 : index
    %176 = vector.load %arg18[%c0_114, %c0_115, %c0_116] : memref<2x1x32xf32, #tpu.memory_space<vmem>>, vector<1x1x32xf32>
    %177 = vector.shape_cast %176 : vector<1x1x32xf32> to vector<1x32xf32>
    %178 = vector.broadcast %177 : vector<1x32xf32> to vector<16x32xf32>
    %179 = arith.addf %175, %178 : vector<16x32xf32>
    %180 = arith.addf %150, %179 : vector<16x32xf32>
    %c0_117 = arith.constant 0 : index
    %c0_118 = arith.constant 0 : index
    %c0_119 = arith.constant 0 : index
    %181 = vector.load %arg19[%c0_117, %c0_118, %c0_119] : memref<2x1x32xf32, #tpu.memory_space<vmem>>, vector<1x1x32xf32>
    %182 = vector.shape_cast %181 : vector<1x1x32xf32> to vector<1x32xf32>
    %c0_120 = arith.constant 0 : index
    %c0_121 = arith.constant 0 : index
    %c0_122 = arith.constant 0 : index
    %183 = vector.load %arg20[%c0_120, %c0_121, %c0_122] : memref<2x1x32xf32, #tpu.memory_space<vmem>>, vector<1x1x32xf32>
    %184 = vector.shape_cast %183 : vector<1x1x32xf32> to vector<1x32xf32>
    %cst_123 = arith.constant dense<0.000000e+00> : vector<16xf32>
    %185 = vector.multi_reduction <add>, %180, %cst_123 [1] : vector<16x32xf32> to vector<16xf32>
    %186 = vector.shape_cast %185 : vector<16xf32> to vector<16x1xf32>
    %cst_124 = arith.constant 3.200000e+01 : f32
    %187 = vector.broadcast %cst_124 : f32 to vector<16x1xf32>
    %188 = arith.divf %186, %187 : vector<16x1xf32>
    %189 = vector.broadcast %188 : vector<16x1xf32> to vector<16x32xf32>
    %190 = arith.subf %180, %189 : vector<16x32xf32>
    %191 = arith.mulf %190, %190 : vector<16x32xf32>
    %cst_125 = arith.constant dense<0.000000e+00> : vector<16xf32>
    %192 = vector.multi_reduction <add>, %191, %cst_125 [1] : vector<16x32xf32> to vector<16xf32>
    %193 = vector.shape_cast %192 : vector<16xf32> to vector<16x1xf32>
    %cst_126 = arith.constant 3.200000e+01 : f32
    %194 = vector.broadcast %cst_126 : f32 to vector<16x1xf32>
    %195 = arith.divf %193, %194 : vector<16x1xf32>
    %196 = vector.broadcast %188 : vector<16x1xf32> to vector<16x32xf32>
    %197 = arith.subf %180, %196 : vector<16x32xf32>
    %cst_127 = arith.constant 9.99999996E-13 : f32
    %198 = vector.broadcast %cst_127 : f32 to vector<16x1xf32>
    %199 = arith.addf %195, %198 : vector<16x1xf32>
    %200 = math.rsqrt %199 : vector<16x1xf32>
    %201 = vector.broadcast %200 : vector<16x1xf32> to vector<16x32xf32>
    %202 = arith.mulf %197, %201 : vector<16x32xf32>
    %203 = vector.broadcast %182 : vector<1x32xf32> to vector<16x32xf32>
    %204 = arith.mulf %202, %203 : vector<16x32xf32>
    %205 = vector.broadcast %184 : vector<1x32xf32> to vector<16x32xf32>
    %206 = arith.addf %204, %205 : vector<16x32xf32>
    %207 = arith.truncf %206 : vector<16x32xf32> to vector<16x32xbf16>
    %cst_128 = arith.constant 0.000000e+00 : f32
    %208 = vector.broadcast %cst_128 : f32 to vector<16x32xf32>
    %c1_129 = arith.constant 1 : index
    %c0_130 = arith.constant 0 : index
    %c0_131 = arith.constant 0 : index
    %c0_132 = arith.constant 0 : index
    %209 = vector.load %arg5[%c1_129, %c0_130, %c0_131, %c0_132] : memref<2x2x32x16xbf16, #tpu.memory_space<vmem>>, vector<1x1x32x16xbf16>
    %210 = vector.shape_cast %209 : vector<1x1x32x16xbf16> to vector<32x16xbf16>
    %cst_133 = arith.constant dense<0.000000e+00> : vector<16x16xf32>
    %211 = tpu.matmul %207, %210, %cst_133 {dimension_numbers = #tpu.dot_dimension_numbers<[1], [0], [0], [1], [0, 0, 1, 1], [], []>} : vector<16x32xbf16>, vector<32x16xbf16>, vector<16x16xf32> -> vector<16x16xf32>
    %c1_134 = arith.constant 1 : index
    %c0_135 = arith.constant 0 : index
    %c0_136 = arith.constant 0 : index
    %c0_137 = arith.constant 0 : index
    %212 = vector.load %arg6[%c1_134, %c0_135, %c0_136, %c0_137] : memref<2x2x1x16xf32, #tpu.memory_space<vmem>>, vector<1x1x1x16xf32>
    %213 = vector.shape_cast %212 : vector<1x1x1x16xf32> to vector<1x16xf32>
    %214 = vector.broadcast %213 : vector<1x16xf32> to vector<16x16xf32>
    %215 = arith.addf %211, %214 : vector<16x16xf32>
    %216 = arith.truncf %215 : vector<16x16xf32> to vector<16x16xbf16>
    %c1_138 = arith.constant 1 : index
    %c0_139 = arith.constant 0 : index
    %c0_140 = arith.constant 0 : index
    %c0_141 = arith.constant 0 : index
    %217 = vector.load %arg7[%c1_138, %c0_139, %c0_140, %c0_141] : memref<2x2x32x16xbf16, #tpu.memory_space<vmem>>, vector<1x1x32x16xbf16>
    %218 = vector.shape_cast %217 : vector<1x1x32x16xbf16> to vector<32x16xbf16>
    %cst_142 = arith.constant dense<0.000000e+00> : vector<16x16xf32>
    %219 = tpu.matmul %207, %218, %cst_142 {dimension_numbers = #tpu.dot_dimension_numbers<[1], [0], [0], [1], [0, 0, 1, 1], [], []>} : vector<16x32xbf16>, vector<32x16xbf16>, vector<16x16xf32> -> vector<16x16xf32>
    %c1_143 = arith.constant 1 : index
    %c0_144 = arith.constant 0 : index
    %c0_145 = arith.constant 0 : index
    %c0_146 = arith.constant 0 : index
    %220 = vector.load %arg8[%c1_143, %c0_144, %c0_145, %c0_146] : memref<2x2x1x16xf32, #tpu.memory_space<vmem>>, vector<1x1x1x16xf32>
    %221 = vector.shape_cast %220 : vector<1x1x1x16xf32> to vector<1x16xf32>
    %222 = vector.broadcast %221 : vector<1x16xf32> to vector<16x16xf32>
    %223 = arith.addf %219, %222 : vector<16x16xf32>
    %224 = arith.truncf %223 : vector<16x16xf32> to vector<16x16xbf16>
    %c1_147 = arith.constant 1 : index
    %c0_148 = arith.constant 0 : index
    %c0_149 = arith.constant 0 : index
    %c0_150 = arith.constant 0 : index
    %225 = vector.load %arg9[%c1_147, %c0_148, %c0_149, %c0_150] : memref<2x2x32x16xbf16, #tpu.memory_space<vmem>>, vector<1x1x32x16xbf16>
    %226 = vector.shape_cast %225 : vector<1x1x32x16xbf16> to vector<32x16xbf16>
    %cst_151 = arith.constant dense<0.000000e+00> : vector<16x16xf32>
    %227 = tpu.matmul %207, %226, %cst_151 {dimension_numbers = #tpu.dot_dimension_numbers<[1], [0], [0], [1], [0, 0, 1, 1], [], []>} : vector<16x32xbf16>, vector<32x16xbf16>, vector<16x16xf32> -> vector<16x16xf32>
    %c1_152 = arith.constant 1 : index
    %c0_153 = arith.constant 0 : index
    %c0_154 = arith.constant 0 : index
    %c0_155 = arith.constant 0 : index
    %228 = vector.load %arg10[%c1_152, %c0_153, %c0_154, %c0_155] : memref<2x2x1x16xf32, #tpu.memory_space<vmem>>, vector<1x1x1x16xf32>
    %229 = vector.shape_cast %228 : vector<1x1x1x16xf32> to vector<1x16xf32>
    %230 = vector.broadcast %229 : vector<1x16xf32> to vector<16x16xf32>
    %231 = arith.addf %227, %230 : vector<16x16xf32>
    %232 = arith.truncf %231 : vector<16x16xf32> to vector<16x16xbf16>
    %233 = tpu.transpose %224, [1, 0] : vector<16x16xbf16> -> vector<16x16xbf16>
    %cst_156 = arith.constant dense<0.000000e+00> : vector<16x16xf32>
    %234 = tpu.matmul %216, %233, %cst_156 {dimension_numbers = #tpu.dot_dimension_numbers<[1], [0], [0], [1], [0, 0, 1, 1], [], []>} : vector<16x16xbf16>, vector<16x16xbf16>, vector<16x16xf32> -> vector<16x16xf32>
    %cst_157 = arith.constant 2.500000e-01 : f32
    %235 = vector.broadcast %cst_157 : f32 to vector<16x16xf32>
    %236 = arith.mulf %234, %235 : vector<16x16xf32>
    %237 = arith.addf %236, %25 : vector<16x16xf32>
    %cst_158 = arith.constant dense<0xFF800000> : vector<16xf32>
    %238 = vector.multi_reduction <maximumf>, %237, %cst_158 [1] : vector<16x16xf32> to vector<16xf32>
    %239 = vector.shape_cast %238 : vector<16xf32> to vector<16x1xf32>
    %240 = vector.broadcast %239 : vector<16x1xf32> to vector<16x16xf32>
    %241 = arith.subf %237, %240 : vector<16x16xf32>
    %242 = math.exp %241 : vector<16x16xf32>
    %cst_159 = arith.constant dense<0.000000e+00> : vector<16xf32>
    %243 = vector.multi_reduction <add>, %242, %cst_159 [1] : vector<16x16xf32> to vector<16xf32>
    %244 = vector.shape_cast %243 : vector<16xf32> to vector<16x1xf32>
    %245 = tpu.reciprocal %244 {approx = true} : vector<16x1xf32> -> vector<16x1xf32>
    %246 = vector.broadcast %245 : vector<16x1xf32> to vector<16x16xf32>
    %247 = arith.mulf %242, %246 : vector<16x16xf32>
    %248 = arith.truncf %247 : vector<16x16xf32> to vector<16x16xbf16>
    %cst_160 = arith.constant dense<0.000000e+00> : vector<16x16xf32>
    %249 = tpu.matmul %248, %232, %cst_160 {dimension_numbers = #tpu.dot_dimension_numbers<[1], [0], [0], [1], [0, 0, 1, 1], [], []>} : vector<16x16xbf16>, vector<16x16xbf16>, vector<16x16xf32> -> vector<16x16xf32>
    %250 = arith.truncf %249 : vector<16x16xf32> to vector<16x16xbf16>
    %c1_161 = arith.constant 1 : index
    %c0_162 = arith.constant 0 : index
    %c0_163 = arith.constant 0 : index
    %c0_164 = arith.constant 0 : index
    %251 = vector.load %arg11[%c1_161, %c0_162, %c0_163, %c0_164] : memref<2x2x16x32xbf16, #tpu.memory_space<vmem>>, vector<1x1x16x32xbf16>
    %252 = vector.shape_cast %251 : vector<1x1x16x32xbf16> to vector<16x32xbf16>
    %cst_165 = arith.constant dense<0.000000e+00> : vector<16x32xf32>
    %253 = tpu.matmul %250, %252, %cst_165 {dimension_numbers = #tpu.dot_dimension_numbers<[1], [0], [0], [1], [0, 0, 1, 1], [], []>} : vector<16x16xbf16>, vector<16x32xbf16>, vector<16x32xf32> -> vector<16x32xf32>
    %254 = arith.addf %208, %253 : vector<16x32xf32>
    %c1_166 = arith.constant 1 : index
    %c1_167 = arith.constant 1 : index
    %c0_168 = arith.constant 0 : index
    %c0_169 = arith.constant 0 : index
    %255 = vector.load %arg5[%c1_166, %c1_167, %c0_168, %c0_169] : memref<2x2x32x16xbf16, #tpu.memory_space<vmem>>, vector<1x1x32x16xbf16>
    %256 = vector.shape_cast %255 : vector<1x1x32x16xbf16> to vector<32x16xbf16>
    %cst_170 = arith.constant dense<0.000000e+00> : vector<16x16xf32>
    %257 = tpu.matmul %207, %256, %cst_170 {dimension_numbers = #tpu.dot_dimension_numbers<[1], [0], [0], [1], [0, 0, 1, 1], [], []>} : vector<16x32xbf16>, vector<32x16xbf16>, vector<16x16xf32> -> vector<16x16xf32>
    %c1_171 = arith.constant 1 : index
    %c1_172 = arith.constant 1 : index
    %c0_173 = arith.constant 0 : index
    %c0_174 = arith.constant 0 : index
    %258 = vector.load %arg6[%c1_171, %c1_172, %c0_173, %c0_174] : memref<2x2x1x16xf32, #tpu.memory_space<vmem>>, vector<1x1x1x16xf32>
    %259 = vector.shape_cast %258 : vector<1x1x1x16xf32> to vector<1x16xf32>
    %260 = vector.broadcast %259 : vector<1x16xf32> to vector<16x16xf32>
    %261 = arith.addf %257, %260 : vector<16x16xf32>
    %262 = arith.truncf %261 : vector<16x16xf32> to vector<16x16xbf16>
    %c1_175 = arith.constant 1 : index
    %c1_176 = arith.constant 1 : index
    %c0_177 = arith.constant 0 : index
    %c0_178 = arith.constant 0 : index
    %263 = vector.load %arg7[%c1_175, %c1_176, %c0_177, %c0_178] : memref<2x2x32x16xbf16, #tpu.memory_space<vmem>>, vector<1x1x32x16xbf16>
    %264 = vector.shape_cast %263 : vector<1x1x32x16xbf16> to vector<32x16xbf16>
    %cst_179 = arith.constant dense<0.000000e+00> : vector<16x16xf32>
    %265 = tpu.matmul %207, %264, %cst_179 {dimension_numbers = #tpu.dot_dimension_numbers<[1], [0], [0], [1], [0, 0, 1, 1], [], []>} : vector<16x32xbf16>, vector<32x16xbf16>, vector<16x16xf32> -> vector<16x16xf32>
    %c1_180 = arith.constant 1 : index
    %c1_181 = arith.constant 1 : index
    %c0_182 = arith.constant 0 : index
    %c0_183 = arith.constant 0 : index
    %266 = vector.load %arg8[%c1_180, %c1_181, %c0_182, %c0_183] : memref<2x2x1x16xf32, #tpu.memory_space<vmem>>, vector<1x1x1x16xf32>
    %267 = vector.shape_cast %266 : vector<1x1x1x16xf32> to vector<1x16xf32>
    %268 = vector.broadcast %267 : vector<1x16xf32> to vector<16x16xf32>
    %269 = arith.addf %265, %268 : vector<16x16xf32>
    %270 = arith.truncf %269 : vector<16x16xf32> to vector<16x16xbf16>
    %c1_184 = arith.constant 1 : index
    %c1_185 = arith.constant 1 : index
    %c0_186 = arith.constant 0 : index
    %c0_187 = arith.constant 0 : index
    %271 = vector.load %arg9[%c1_184, %c1_185, %c0_186, %c0_187] : memref<2x2x32x16xbf16, #tpu.memory_space<vmem>>, vector<1x1x32x16xbf16>
    %272 = vector.shape_cast %271 : vector<1x1x32x16xbf16> to vector<32x16xbf16>
    %cst_188 = arith.constant dense<0.000000e+00> : vector<16x16xf32>
    %273 = tpu.matmul %207, %272, %cst_188 {dimension_numbers = #tpu.dot_dimension_numbers<[1], [0], [0], [1], [0, 0, 1, 1], [], []>} : vector<16x32xbf16>, vector<32x16xbf16>, vector<16x16xf32> -> vector<16x16xf32>
    %c1_189 = arith.constant 1 : index
    %c1_190 = arith.constant 1 : index
    %c0_191 = arith.constant 0 : index
    %c0_192 = arith.constant 0 : index
    %274 = vector.load %arg10[%c1_189, %c1_190, %c0_191, %c0_192] : memref<2x2x1x16xf32, #tpu.memory_space<vmem>>, vector<1x1x1x16xf32>
    %275 = vector.shape_cast %274 : vector<1x1x1x16xf32> to vector<1x16xf32>
    %276 = vector.broadcast %275 : vector<1x16xf32> to vector<16x16xf32>
    %277 = arith.addf %273, %276 : vector<16x16xf32>
    %278 = arith.truncf %277 : vector<16x16xf32> to vector<16x16xbf16>
    %279 = tpu.transpose %270, [1, 0] : vector<16x16xbf16> -> vector<16x16xbf16>
    %cst_193 = arith.constant dense<0.000000e+00> : vector<16x16xf32>
    %280 = tpu.matmul %262, %279, %cst_193 {dimension_numbers = #tpu.dot_dimension_numbers<[1], [0], [0], [1], [0, 0, 1, 1], [], []>} : vector<16x16xbf16>, vector<16x16xbf16>, vector<16x16xf32> -> vector<16x16xf32>
    %cst_194 = arith.constant 2.500000e-01 : f32
    %281 = vector.broadcast %cst_194 : f32 to vector<16x16xf32>
    %282 = arith.mulf %280, %281 : vector<16x16xf32>
    %283 = arith.addf %282, %25 : vector<16x16xf32>
    %cst_195 = arith.constant dense<0xFF800000> : vector<16xf32>
    %284 = vector.multi_reduction <maximumf>, %283, %cst_195 [1] : vector<16x16xf32> to vector<16xf32>
    %285 = vector.shape_cast %284 : vector<16xf32> to vector<16x1xf32>
    %286 = vector.broadcast %285 : vector<16x1xf32> to vector<16x16xf32>
    %287 = arith.subf %283, %286 : vector<16x16xf32>
    %288 = math.exp %287 : vector<16x16xf32>
    %cst_196 = arith.constant dense<0.000000e+00> : vector<16xf32>
    %289 = vector.multi_reduction <add>, %288, %cst_196 [1] : vector<16x16xf32> to vector<16xf32>
    %290 = vector.shape_cast %289 : vector<16xf32> to vector<16x1xf32>
    %291 = tpu.reciprocal %290 {approx = true} : vector<16x1xf32> -> vector<16x1xf32>
    %292 = vector.broadcast %291 : vector<16x1xf32> to vector<16x16xf32>
    %293 = arith.mulf %288, %292 : vector<16x16xf32>
    %294 = arith.truncf %293 : vector<16x16xf32> to vector<16x16xbf16>
    %cst_197 = arith.constant dense<0.000000e+00> : vector<16x16xf32>
    %295 = tpu.matmul %294, %278, %cst_197 {dimension_numbers = #tpu.dot_dimension_numbers<[1], [0], [0], [1], [0, 0, 1, 1], [], []>} : vector<16x16xbf16>, vector<16x16xbf16>, vector<16x16xf32> -> vector<16x16xf32>
    %296 = arith.truncf %295 : vector<16x16xf32> to vector<16x16xbf16>
    %c1_198 = arith.constant 1 : index
    %c1_199 = arith.constant 1 : index
    %c0_200 = arith.constant 0 : index
    %c0_201 = arith.constant 0 : index
    %297 = vector.load %arg11[%c1_198, %c1_199, %c0_200, %c0_201] : memref<2x2x16x32xbf16, #tpu.memory_space<vmem>>, vector<1x1x16x32xbf16>
    %298 = vector.shape_cast %297 : vector<1x1x16x32xbf16> to vector<16x32xbf16>
    %cst_202 = arith.constant dense<0.000000e+00> : vector<16x32xf32>
    %299 = tpu.matmul %296, %298, %cst_202 {dimension_numbers = #tpu.dot_dimension_numbers<[1], [0], [0], [1], [0, 0, 1, 1], [], []>} : vector<16x16xbf16>, vector<16x32xbf16>, vector<16x32xf32> -> vector<16x32xf32>
    %300 = arith.addf %254, %299 : vector<16x32xf32>
    %c1_203 = arith.constant 1 : index
    %c0_204 = arith.constant 0 : index
    %c0_205 = arith.constant 0 : index
    %301 = vector.load %arg12[%c1_203, %c0_204, %c0_205] : memref<2x1x32xf32, #tpu.memory_space<vmem>>, vector<1x1x32xf32>
    %302 = vector.shape_cast %301 : vector<1x1x32xf32> to vector<1x32xf32>
    %303 = vector.broadcast %302 : vector<1x32xf32> to vector<16x32xf32>
    %304 = arith.addf %300, %303 : vector<16x32xf32>
    %305 = arith.addf %206, %304 : vector<16x32xf32>
    %c1_206 = arith.constant 1 : index
    %c0_207 = arith.constant 0 : index
    %c0_208 = arith.constant 0 : index
    %306 = vector.load %arg13[%c1_206, %c0_207, %c0_208] : memref<2x1x32xf32, #tpu.memory_space<vmem>>, vector<1x1x32xf32>
    %307 = vector.shape_cast %306 : vector<1x1x32xf32> to vector<1x32xf32>
    %c1_209 = arith.constant 1 : index
    %c0_210 = arith.constant 0 : index
    %c0_211 = arith.constant 0 : index
    %308 = vector.load %arg14[%c1_209, %c0_210, %c0_211] : memref<2x1x32xf32, #tpu.memory_space<vmem>>, vector<1x1x32xf32>
    %309 = vector.shape_cast %308 : vector<1x1x32xf32> to vector<1x32xf32>
    %cst_212 = arith.constant dense<0.000000e+00> : vector<16xf32>
    %310 = vector.multi_reduction <add>, %305, %cst_212 [1] : vector<16x32xf32> to vector<16xf32>
    %311 = vector.shape_cast %310 : vector<16xf32> to vector<16x1xf32>
    %cst_213 = arith.constant 3.200000e+01 : f32
    %312 = vector.broadcast %cst_213 : f32 to vector<16x1xf32>
    %313 = arith.divf %311, %312 : vector<16x1xf32>
    %314 = vector.broadcast %313 : vector<16x1xf32> to vector<16x32xf32>
    %315 = arith.subf %305, %314 : vector<16x32xf32>
    %316 = arith.mulf %315, %315 : vector<16x32xf32>
    %cst_214 = arith.constant dense<0.000000e+00> : vector<16xf32>
    %317 = vector.multi_reduction <add>, %316, %cst_214 [1] : vector<16x32xf32> to vector<16xf32>
    %318 = vector.shape_cast %317 : vector<16xf32> to vector<16x1xf32>
    %cst_215 = arith.constant 3.200000e+01 : f32
    %319 = vector.broadcast %cst_215 : f32 to vector<16x1xf32>
    %320 = arith.divf %318, %319 : vector<16x1xf32>
    %321 = vector.broadcast %313 : vector<16x1xf32> to vector<16x32xf32>
    %322 = arith.subf %305, %321 : vector<16x32xf32>
    %cst_216 = arith.constant 9.99999996E-13 : f32
    %323 = vector.broadcast %cst_216 : f32 to vector<16x1xf32>
    %324 = arith.addf %320, %323 : vector<16x1xf32>
    %325 = math.rsqrt %324 : vector<16x1xf32>
    %326 = vector.broadcast %325 : vector<16x1xf32> to vector<16x32xf32>
    %327 = arith.mulf %322, %326 : vector<16x32xf32>
    %328 = vector.broadcast %307 : vector<1x32xf32> to vector<16x32xf32>
    %329 = arith.mulf %327, %328 : vector<16x32xf32>
    %330 = vector.broadcast %309 : vector<1x32xf32> to vector<16x32xf32>
    %331 = arith.addf %329, %330 : vector<16x32xf32>
    %332 = arith.truncf %331 : vector<16x32xf32> to vector<16x32xbf16>
    %c1_217 = arith.constant 1 : index
    %c0_218 = arith.constant 0 : index
    %c0_219 = arith.constant 0 : index
    %333 = vector.load %arg15[%c1_217, %c0_218, %c0_219] : memref<2x32x64xbf16, #tpu.memory_space<vmem>>, vector<1x32x64xbf16>
    %334 = vector.shape_cast %333 : vector<1x32x64xbf16> to vector<32x64xbf16>
    %cst_220 = arith.constant dense<0.000000e+00> : vector<16x64xf32>
    %335 = tpu.matmul %332, %334, %cst_220 {dimension_numbers = #tpu.dot_dimension_numbers<[1], [0], [0], [1], [0, 0, 1, 1], [], []>} : vector<16x32xbf16>, vector<32x64xbf16>, vector<16x64xf32> -> vector<16x64xf32>
    %c1_221 = arith.constant 1 : index
    %c0_222 = arith.constant 0 : index
    %c0_223 = arith.constant 0 : index
    %336 = vector.load %arg16[%c1_221, %c0_222, %c0_223] : memref<2x1x64xf32, #tpu.memory_space<vmem>>, vector<1x1x64xf32>
    %337 = vector.shape_cast %336 : vector<1x1x64xf32> to vector<1x64xf32>
    %338 = vector.broadcast %337 : vector<1x64xf32> to vector<16x64xf32>
    %339 = arith.addf %335, %338 : vector<16x64xf32>
    %340 = arith.mulf %339, %339 : vector<16x64xf32>
    %341 = arith.mulf %339, %340 : vector<16x64xf32>
    %cst_224 = arith.constant 4.471500e-02 : f32
    %342 = vector.broadcast %cst_224 : f32 to vector<16x64xf32>
    %343 = arith.mulf %342, %341 : vector<16x64xf32>
    %344 = arith.addf %339, %343 : vector<16x64xf32>
    %cst_225 = arith.constant 0.797884583 : f32
    %345 = vector.broadcast %cst_225 : f32 to vector<16x64xf32>
    %346 = arith.mulf %345, %344 : vector<16x64xf32>
    %347 = math.tanh %346 : vector<16x64xf32>
    %cst_226 = arith.constant 1.000000e+00 : f32
    %348 = vector.broadcast %cst_226 : f32 to vector<16x64xf32>
    %349 = arith.addf %348, %347 : vector<16x64xf32>
    %cst_227 = arith.constant 5.000000e-01 : f32
    %350 = vector.broadcast %cst_227 : f32 to vector<16x64xf32>
    %351 = arith.mulf %350, %349 : vector<16x64xf32>
    %352 = arith.mulf %339, %351 : vector<16x64xf32>
    %353 = arith.truncf %352 : vector<16x64xf32> to vector<16x64xbf16>
    %c1_228 = arith.constant 1 : index
    %c0_229 = arith.constant 0 : index
    %c0_230 = arith.constant 0 : index
    %354 = vector.load %arg17[%c1_228, %c0_229, %c0_230] : memref<2x64x32xbf16, #tpu.memory_space<vmem>>, vector<1x64x32xbf16>
    %355 = vector.shape_cast %354 : vector<1x64x32xbf16> to vector<64x32xbf16>
    %cst_231 = arith.constant dense<0.000000e+00> : vector<16x32xf32>
    %356 = tpu.matmul %353, %355, %cst_231 {dimension_numbers = #tpu.dot_dimension_numbers<[1], [0], [0], [1], [0, 0, 1, 1], [], []>} : vector<16x64xbf16>, vector<64x32xbf16>, vector<16x32xf32> -> vector<16x32xf32>
    %c1_232 = arith.constant 1 : index
    %c0_233 = arith.constant 0 : index
    %c0_234 = arith.constant 0 : index
    %357 = vector.load %arg18[%c1_232, %c0_233, %c0_234] : memref<2x1x32xf32, #tpu.memory_space<vmem>>, vector<1x1x32xf32>
    %358 = vector.shape_cast %357 : vector<1x1x32xf32> to vector<1x32xf32>
    %359 = vector.broadcast %358 : vector<1x32xf32> to vector<16x32xf32>
    %360 = arith.addf %356, %359 : vector<16x32xf32>
    %361 = arith.addf %331, %360 : vector<16x32xf32>
    %c1_235 = arith.constant 1 : index
    %c0_236 = arith.constant 0 : index
    %c0_237 = arith.constant 0 : index
    %362 = vector.load %arg19[%c1_235, %c0_236, %c0_237] : memref<2x1x32xf32, #tpu.memory_space<vmem>>, vector<1x1x32xf32>
    %363 = vector.shape_cast %362 : vector<1x1x32xf32> to vector<1x32xf32>
    %c1_238 = arith.constant 1 : index
    %c0_239 = arith.constant 0 : index
    %c0_240 = arith.constant 0 : index
    %364 = vector.load %arg20[%c1_238, %c0_239, %c0_240] : memref<2x1x32xf32, #tpu.memory_space<vmem>>, vector<1x1x32xf32>
    %365 = vector.shape_cast %364 : vector<1x1x32xf32> to vector<1x32xf32>
    %cst_241 = arith.constant dense<0.000000e+00> : vector<16xf32>
    %366 = vector.multi_reduction <add>, %361, %cst_241 [1] : vector<16x32xf32> to vector<16xf32>
    %367 = vector.shape_cast %366 : vector<16xf32> to vector<16x1xf32>
    %cst_242 = arith.constant 3.200000e+01 : f32
    %368 = vector.broadcast %cst_242 : f32 to vector<16x1xf32>
    %369 = arith.divf %367, %368 : vector<16x1xf32>
    %370 = vector.broadcast %369 : vector<16x1xf32> to vector<16x32xf32>
    %371 = arith.subf %361, %370 : vector<16x32xf32>
    %372 = arith.mulf %371, %371 : vector<16x32xf32>
    %cst_243 = arith.constant dense<0.000000e+00> : vector<16xf32>
    %373 = vector.multi_reduction <add>, %372, %cst_243 [1] : vector<16x32xf32> to vector<16xf32>
    %374 = vector.shape_cast %373 : vector<16xf32> to vector<16x1xf32>
    %cst_244 = arith.constant 3.200000e+01 : f32
    %375 = vector.broadcast %cst_244 : f32 to vector<16x1xf32>
    %376 = arith.divf %374, %375 : vector<16x1xf32>
    %377 = vector.broadcast %369 : vector<16x1xf32> to vector<16x32xf32>
    %378 = arith.subf %361, %377 : vector<16x32xf32>
    %cst_245 = arith.constant 9.99999996E-13 : f32
    %379 = vector.broadcast %cst_245 : f32 to vector<16x1xf32>
    %380 = arith.addf %376, %379 : vector<16x1xf32>
    %381 = math.rsqrt %380 : vector<16x1xf32>
    %382 = vector.broadcast %381 : vector<16x1xf32> to vector<16x32xf32>
    %383 = arith.mulf %378, %382 : vector<16x32xf32>
    %384 = vector.broadcast %363 : vector<1x32xf32> to vector<16x32xf32>
    %385 = arith.mulf %383, %384 : vector<16x32xf32>
    %386 = vector.broadcast %365 : vector<1x32xf32> to vector<16x32xf32>
    %387 = arith.addf %385, %386 : vector<16x32xf32>
    %c0_246 = arith.constant 0 : index
    %c0_247 = arith.constant 0 : index
    %388 = vector.load %arg2[%c0_246, %c0_247] : memref<2x16xf32, #tpu.memory_space<vmem>>, vector<2x16xf32>
    %cst_248 = arith.constant dense<0.000000e+00> : vector<2x32xf32>
    %389 = tpu.matmul %388, %387, %cst_248 {dimension_numbers = #tpu.dot_dimension_numbers<[1], [0], [0], [1], [0, 0, 1, 1], [], []>} : vector<2x16xf32>, vector<16x32xf32>, vector<2x32xf32> -> vector<2x32xf32>
    %c0_249 = arith.constant 0 : index
    %c0_250 = arith.constant 0 : index
    %390 = vector.load %arg23[%c0_249, %c0_250] : memref<1x32xf32, #tpu.memory_space<vmem>>, vector<1x32xf32>
    %391 = vector.broadcast %390 : vector<1x32xf32> to vector<2x32xf32>
    %392 = arith.subf %389, %391 : vector<2x32xf32>
    %c0_251 = arith.constant 0 : index
    %c0_252 = arith.constant 0 : index
    %393 = vector.load %arg24[%c0_251, %c0_252] : memref<1x32xf32, #tpu.memory_space<vmem>>, vector<1x32xf32>
    %cst_253 = arith.constant 9.99999974E-6 : f32
    %394 = vector.broadcast %cst_253 : f32 to vector<1x32xf32>
    %395 = arith.addf %393, %394 : vector<1x32xf32>
    %396 = math.rsqrt %395 : vector<1x32xf32>
    %397 = vector.broadcast %396 : vector<1x32xf32> to vector<2x32xf32>
    %398 = arith.mulf %392, %397 : vector<2x32xf32>
    %c0_254 = arith.constant 0 : index
    %c0_255 = arith.constant 0 : index
    %399 = vector.load %arg21[%c0_254, %c0_255] : memref<1x32xf32, #tpu.memory_space<vmem>>, vector<1x32xf32>
    %400 = vector.broadcast %399 : vector<1x32xf32> to vector<2x32xf32>
    %401 = arith.mulf %398, %400 : vector<2x32xf32>
    %c0_256 = arith.constant 0 : index
    %c0_257 = arith.constant 0 : index
    %402 = vector.load %arg22[%c0_256, %c0_257] : memref<1x32xf32, #tpu.memory_space<vmem>>, vector<1x32xf32>
    %403 = vector.broadcast %402 : vector<1x32xf32> to vector<2x32xf32>
    %404 = arith.addf %401, %403 : vector<2x32xf32>
    %c0_258 = arith.constant 0 : index
    %c0_259 = arith.constant 0 : index
    %405 = vector.load %arg25[%c0_258, %c0_259] : memref<1x32xf32, #tpu.memory_space<vmem>>, vector<1x32xf32>
    %406 = vector.broadcast %405 : vector<1x32xf32> to vector<2x32xf32>
    %407 = arith.mulf %404, %406 : vector<2x32xf32>
    %cst_260 = arith.constant dense<0.000000e+00> : vector<2xf32>
    %408 = vector.multi_reduction <add>, %407, %cst_260 [1] : vector<2x32xf32> to vector<2xf32>
    %409 = vector.shape_cast %408 : vector<2xf32> to vector<2x1xf32>
    %c0_261 = arith.constant 0 : index
    %c0_262 = arith.constant 0 : index
    %410 = vector.load %arg26[%c0_261, %c0_262] : memref<1x1xf32, #tpu.memory_space<vmem>>, vector<1x1xf32>
    %411 = vector.broadcast %410 : vector<1x1xf32> to vector<2x1xf32>
    %412 = arith.addf %409, %411 : vector<2x1xf32>
    %c0_263 = arith.constant 0 : index
    %c0_264 = arith.constant 0 : index
    %413 = vector.load %arg27[%c0_263, %c0_264] : memref<2x1xf32, #tpu.memory_space<vmem>>, vector<2x1xf32>
    tpu.vector_store %arg27[%c0_263, %c0_264], %412 {strides = array<i32>} : memref<2x1xf32, #tpu.memory_space<vmem>>, vector<2x1xf32>,
    return
  }
}

</mosaic_0001>

<bundles_post_ra>
// kernel: emotion_classifier_forward.1
= control target key start
LH: loop header
LB: loop body
LE: loop exit
PB: predicated region body
PF: predicated region fallthrough
CT: control target
= control target key end

     0   :  { %vm93_vm0 = vcmask 261120   ;;  %v2893_v15 = vmov 0.0   ;;  %vm2894_vm1 = vmmov 0   ;;  %vm338_vm2 = vcmask 130048   ;;  %s3507_s0 = inlined_call_operand.vmem [shape: f32[16,32], index: 0, kind: input, shape index: {}]   ;;  %s3508_s5 = inlined_call_operand.vmem [shape: bf16[2,2,32,16], index: 5, kind: input, shape index: {}]   ;;  %s3509_s9 = inlined_call_operand.vmem [shape: bf16[2,2,32,16], index: 9, kind: input, shape index: {}]   ;;  %s3510_s7 = inlined_call_operand.vmem [shape: bf16[2,2,32,16], index: 7, kind: input, shape index: {}]   ;;  %s3511_s3 = inlined_call_operand.vmem [shape: f32[1,32], index: 3, kind: input, shape index: {}]   ;;  %s3512_s4 = inlined_call_operand.vmem [shape: f32[1,32], index: 4, kind: input, shape index: {}]   ;;  %s3513_s6 = inlined_call_operand.vmem [shape: f32[2,2,1,16], index: 6, kind: input, shape index: {}]   ;;  %s3514_s10 = inlined_call_operand.vmem [shape: f32[2,2,1,16], index: 10, kind: input, shape index: {}]   ;;  %s3515_s8 = inlined_call_operand.vmem [shape: f32[2,2,1,16], index: 8, kind: input, shape index: {}]   ;;  %s3516_s1 = inlined_call_operand.vmem [shape: f32[16,16], index: 1, kind: input, shape index: {}]   ;;  %s3517_s11 = inlined_call_operand.vmem [shape: bf16[2,2,16,32], index: 11, kind: input, shape index: {}]   ;;  %s3518_s12 = inlined_call_operand.vmem [shape: f32[2,1,32], index: 12, kind: input, shape index: {}]   ;;  %s3519_s15 = inlined_call_operand.vmem [shape: bf16[2,32,64], index: 15, kind: input, shape index: {}]   ;;  %s3520_s13 = inlined_call_operand.vmem [shape: f32[2,1,32], index: 13, kind: input, shape index: {}]   ;;  %s3521_s14 = inlined_call_operand.vmem [shape: f32[2,1,32], index: 14, kind: input, shape index: {}]   ;;  %s3522_s17 = inlined_call_operand.vmem [shape: bf16[2,64,32], index: 17, kind: input, shape index: {}]   ;;  %s3523_s16 = inlined_call_operand.vmem [shape: f32[2,1,64], index: 16, kind: input, shape index: {}]   ;;  %s3524_s18 = inlined_call_operand.vmem [shape: f32[2,1,32], index: 18, kind: input, shape index: {}]   ;;  %s3525_s19 = inlined_call_operand.vmem [shape: f32[2,1,32], index: 19, kind: input, shape index: {}]   ;;  %s3526_s20 = inlined_call_operand.vmem [shape: f32[2,1,32], index: 20, kind: input, shape index: {}]   ;;  %s3527_s2 = inlined_call_operand.vmem [shape: f32[2,16], index: 2, kind: input, shape index: {}]   ;;  %s3528_s26 = inlined_call_operand.<no memory space> [shape: f32[1,1], index: 26, kind: input, shape index: {}]   ;;  %s3529_s24 = inlined_call_operand.vmem [shape: f32[1,32], index: 24, kind: input, shape index: {}]   ;;  %s3530_s23 = inlined_call_operand.vmem [shape: f32[1,32], index: 23, kind: input, shape index: {}]   ;;  %s3531_s21 = inlined_call_operand.vmem [shape: f32[1,32], index: 21, kind: input, shape index: {}]   ;;  %s3532_s22 = inlined_call_operand.vmem [shape: f32[1,32], index: 22, kind: input, shape index: {}]   ;;  %s3533_s25 = inlined_call_operand.vmem [shape: f32[1,32], index: 25, kind: input, shape index: {}]   ;;  %s3534_s27 = inlined_call_operand.vmem [shape: f32[2,1], index: 27, kind: output, shape index: {}]  }
   0x1   :  { %3545 = sst [smem:[#allocation3_spill]] %s3507_s0  ;;  %2570 = vmatprep.subr.bf16.mxu1 %v2893_v15  ;;  %2586 = vmatprep.subr.bf16.mxu0 %v2893_v15  ;;  %vm1064_vm3 = vcmask 523264   ;;  %vm2301_vm4 = vcmask 254976   ;;  %vm2313_vm5 = vcmask 1024  }
   0x2   :  { %3546 = sst [smem:[#allocation4_spill]] %s3508_s5  ;;  %2574 = vmatprep.mubr.msk.bf16.mxu1 %vm2894_vm1, %v2893_v15  ;;  %2590 = vmatprep.mubr.msk.bf16.mxu0 %vm2894_vm1, %v2893_v15 }
   0x3   :  { %3547 = sst [smem:[#allocation5_spill]] %s3509_s9  ;;  %s3558_s9 = sld [smem:[#allocation3_spill]] }
   0x4   :  { %3548 = sst [smem:[#allocation6_spill]] %s3510_s7  ;;  %s3559_s0 = sld [smem:[#allocation4_spill]] }
   0x5   :  { %3549 = sst [smem:[#allocation7_spill]] %s3511_s3  ;;  %s3560_s5 = sld [smem:[#allocation5_spill]] }
   0x6   :  { %3550 = sst [smem:[#allocation8_spill]] %s3512_s4  ;;  %s3563_s29 = sld [smem:[#allocation6_spill]] }
   0x7   :  { %3551 = sst [smem:[#allocation9_spill]] %s3513_s6  ;;  %s3562_s4 = sld [smem:[#allocation8_spill]] }
   0x8   :  { %3552 = sst [smem:[#allocation10_spill]] %s3514_s10 }
   0x9   :  { %3553 = sst [smem:[#allocation11_spill]] %s3515_s8  ;;  %v89_v0 = vld [vmem:[%s3558_s9] sm:$0xff]  ;;  %v90_v1 = vld [vmem:[%s3558_s9 + $0x8] sm:$0xff]  ;;  %s3561_s9 = sld [smem:[#allocation7_spill]] }
   0xa   :  { %3554 = sst [smem:[#allocation12_spill]] %s3516_s1  ;;  %v94_v2 = vsel %vm93_vm0, %v89_v0, 0.0  ;;  %v97_v3 = vsel %vm93_vm0, %v90_v1, 0.0  ;;  %v2791_v14 = vld [vmem:[%s3559_s0] sm:$0xff]   ;;  %v2793_v17 = vld [vmem:[%s3559_s0 + $0x8] sm:$0xff]   ;;  %s3564_s8 = sld [smem:[#allocation9_spill]] }
   0xb   :  { %3555 = sst [smem:[#allocation13_spill]] %s3517_s11  ;;  %95 = vadd.xlane.f32.xlu0 %v94_v2  ;;  %v2792_v16 = vld [vmem:[%s3560_s5] sm:$0xff]   ;;  %2571 = vmatpush3.bf16.msra.mxu1 %v2791_v14  ;;  %v2794_v18 = vld [vmem:[%s3560_s5 + $0x8] sm:$0xff]   ;;  %s3565_s30 = sld [smem:[#allocation10_spill]]  ;;  %v2797_v63 = vld [vmem:[%s3559_s0 + $0x10] sm:$0xff]  }
   0xc   :  { %3556 = sst [smem:[#allocation14_spill]] %s3518_s12  ;;  %2587 = vmatpush3.bf16.msra.mxu0 %v2792_v16  ;;  %2572 = vmatprep.subr.bf16.mxu1 %v2893_v15  ;;  %v2795_v35 = vld [vmem:[%s3563_s29] sm:$0xff]   ;;  %v2796_v37 = vld [vmem:[%s3563_s29 + $0x8] sm:$0xff]   ;;  %s3566_s28 = sld [smem:[#allocation11_spill]]  ;;  %v2800_v2 = vld [vmem:[%s3560_s5 + $0x18] sm:$0xff]  }
   0xd   :  { %3557 = sst [smem:[#allocation15_spill]] %s3534_s27  ;;  %2588 = vmatprep.subr.bf16.mxu0 %v2893_v15  ;;  %v2320_v31 = vld [vmem:[%s3562_s4] ss:$0 sm:$0xff]  ;;  %s3567_s6 = sld [smem:[#allocation12_spill]] }
   0xe   :  { %s3568_s1 = sld [smem:[#allocation13_spill]]  ;;  %s3569_s3 = sld [smem:[#allocation14_spill]] }
   0xf   :  { %98 = vadd.xlane.f32.xlu0 %v97_v3  ;;  %2573 = vmatpush3.bf16.msra.mxu1 %v2793_v17  ;;  %v2319_v27 = vld [vmem:[%s3561_s9] ss:$0 sm:$0xff]  ;;  %s3570_s27 = sld [smem:[#allocation15_spill]] }
  0x10   :  { %2589 = vmatpush3.bf16.msra.mxu0 %v2794_v18  ;;  %2578 = vmatprep.subr.bf16.mxu1 %v2893_v15  ;;  %v2321_v38 = vld [vmem:[%s3564_s8] ss:$0 sm:$0xff]  ;;  %v2340_v16 = vld [vmem:[%s3564_s8 + $0x1] ss:$0 sm:$0xff] }
  0x11   :  { %2600 = vmatprep.subr.bf16.mxu0 %v2893_v15  ;;  %v2329_v40 = vld [vmem:[%s3565_s30] ss:$0 sm:$0xff] }
  0x12   :  { %v2325_v54 = vld [vmem:[%s3566_s28] ss:$0 sm:$0xff] }
  0x98   :  { %v96_v4 = vpop.xlane.xlu0 %95 }
  0x99   :  { %v101_v5 = vmul.f32 0.03125, %v96_v4  ;;  %v3144_v4 = vld [vmem:[%s3567_s6] sm:$0xff] }
  0x9b   :  { %v103_v6 = vsub.f32 %v89_v0, %v101_v5  ;;  %v2798_v0 = vld [vmem:[%s3559_s0 + $0x18] sm:$0xff]  }
  0x9c   :  { %v99_v7 = vpop.xlane.xlu0 %98 }
  0x9d   :  { %v102_v8 = vmul.f32 0.03125, %v99_v7  ;;  %v105_v9 = vmul.f32 %v103_v6, %v103_v6 }
  0x9f   :  { %v104_v10 = vsub.f32 %v90_v1, %v102_v8  ;;  %v107_v11 = vsel %vm93_vm0, %v105_v9, 0.0  ;;  %v2799_v1 = vld [vmem:[%s3560_s5 + $0x10] sm:$0xff]   ;;  %v3149_v8 = vld [vmem:[%s3567_s6 + $0x8] sm:$0xff] }
  0xa0   :  { %108 = vadd.xlane.f32.xlu1 %v107_v11 }
  0xa1   :  { %v106_v12 = vmul.f32 %v104_v10, %v104_v10 }
  0xa3   :  { %v110_v13 = vsel %vm93_vm0, %v106_v12, 0.0 }
  0xa4   :  { %111 = vadd.xlane.f32.xlu1 %v110_v13 }
 0x12d   :  { %v109_v19 = vpop.xlane.xlu1 %108 }
 0x12e   :  { %v113_v20 = vmul.f32 0.03125, %v109_v19 }
 0x130   :  { %v115_v21 = vadd.f32 1e-12, %v113_v20 }
 0x131   :  { %v112_v22 = vpop.xlane.xlu1 %111 }
 0x132   :  { %2831 = vrsqrt.f32 %v115_v21  ;;  %v114_v23 = vmul.f32 0.03125, %v112_v22 }
 0x134   :  { %v116_v24 = vadd.f32 1e-12, %v114_v23 }
 0x136   :  { %2833 = vrsqrt.f32 %v116_v24  ;;  %v2358_v24 = vld [vmem:[%s3565_s30 + $0x1] ss:$0 sm:$0xff] }
 0x13c   :  { %v2832_v25 = vpop.eup %2831 }
 0x13d   :  { %v119_v26 = vmul.f32 %v2832_v25, %v103_v6 }
 0x13f   :  { %v127_v29 = vmul.f32 %v2319_v27, %v119_v26 }
 0x140   :  { %v2834_v28 = vpop.eup %2833 }
 0x141   :  { %v120_v30 = vmul.f32 %v2834_v28, %v104_v10  ;;  %v3074_v33 = vadd.f32 %v2320_v31, %v127_v29 }
 0x143   :  { %v128_v32 = vmul.f32 %v2319_v27, %v120_v30 }
 0x145   :  { %v3076_v34 = vadd.f32 %v2320_v31, %v128_v32 }
 0x147   :  { %v3083_v36 = vpack.c.bf16 %v3076_v34, %v3074_v33 }
 0x149   :  { %2575 = vmatmul.mubr.msk.bf16.vlgmr.msra.gmra.mrb[0].mxu1 %vm93_vm0, %v3083_v36  ;;  %2591 = vmatmul.mubr.msk.bf16.vlgmr.msra.gmra.mrb[0].mxu0 %vm93_vm0, %v3083_v36 }
 0x14a   :  { %2579 = vmatpush3.bf16.msra.mxu1 %v2795_v35  ;;  %2582 = vmatprep.mubr.msk.bf16.mxu1 %vm2894_vm1, %v2893_v15 }
 0x14b   :  { %2580 = vmatprep.subr.bf16.mxu1 %v2893_v15  ;;  %2602 = vmatprep.mubr.msk.bf16.mxu0 %vm2894_vm1, %v2893_v15 }
 0x14e   :  { %2581 = vmatpush3.bf16.msra.mxu1 %v2796_v37 }
 0x14f   :  { %2594 = vmatprep.subr.bf16.mxu1 %v2893_v15 }
 0x151   :  { %2583 = vmatmul.mubr.msk.bf16.vlgmr.msra.gmra.mrb[4].mxu1 %vm93_vm0, %v3083_v36 }
 0x152   :  { %2596 = vmatprep.mubr.msk.bf16.mxu1 %vm2894_vm1, %v2893_v15 }
 0x21c   :  { %v200_v39 = vpop.f32.mrb[0].mxu1  ;;  %v330_v41 = vpop.f32.mrb[0].mxu0 }
 0x21d   :  { %v2576_v42 = vpop.f32.mrb[1].mxu1  ;;  %v2592_v43 = vpop.f32.mrb[1].mxu0  ;;  %v201_v46 = vadd.f32 %v2321_v38, %v200_v39  ;;  %v331_v47 = vadd.f32 %v2329_v40, %v330_v41 }
 0x21e   :  { %v203_v44 = vpop.f32.mrb[2].mxu1  ;;  %v333_v45 = vpop.f32.mrb[2].mxu0 }
 0x21f   :  { %v204_v48 = vadd.f32 %v2321_v38, %v203_v44  ;;  %v334_v49 = vadd.f32 %v2329_v40, %v333_v45  ;;  %v2577_v50 = vpop.f32.mrb[3].mxu1  ;;  %v2593_v51 = vpop.f32.mrb[3].mxu0 }
 0x220   :  { %v2801_v51 = vld [vmem:[%s3563_s29 + $0x10] sm:$0xff]  }
 0x221   :  { %v207_v52 = vpack.c.bf16 %v204_v48, %v201_v46  ;;  %v337_v53 = vpack.c.bf16 %v334_v49, %v331_v47 }
 0x223   :  { %2601 = vmatpush3.bf16.msra.mxu0 %v337_v53  ;;  %v2802_v53 = vld [vmem:[%s3563_s29 + $0x18] sm:$0xff]  }
 0x224   :  { %v265_v55 = vpop.f32.mrb[4].mxu1  ;;  %2614 = vmatprep.subr.bf16.mxu0 %v2893_v15 }
 0x225   :  { %v2584_v56 = vpop.f32.mrb[5].mxu1  ;;  %v266_v58 = vadd.f32 %v2325_v54, %v265_v55 }
 0x226   :  { %v268_v57 = vpop.f32.mrb[6].mxu1 }
 0x227   :  { %v269_v59 = vadd.f32 %v2325_v54, %v268_v57  ;;  %v2585_v60 = vpop.f32.mrb[7].mxu1 }
 0x229   :  { %v272_v61 = vpack.c.bf16 %v269_v59, %v266_v58  ;;  %v2349_v59 = vld [vmem:[%s3566_s28 + $0x1] ss:$0 sm:$0xff] }
 0x22b   :  { %v343_v62 = vsel %vm338_vm2, %v272_v61, 0 }
 0x22c   :  { %2595 = vmatpush3.bf16.xpose.msra.mxu1 %v343_v62 }
 0x22d   :  { %2606 = vmatprep.subr.bf16.mxu1 %v2893_v15 }
 0x233   :  { %2597 = vmatmul.mubr.msk.bf16.vlgmr.msra.gmra.mrb[8].mxu1 %vm338_vm2, %v207_v52 }
 0x234   :  { %2607 = vmatpush3.bf16.msra.mxu1 %v2797_v63  ;;  %2610 = vmatprep.mubr.msk.bf16.mxu1 %vm2894_vm1, %v2893_v15 }
 0x235   :  { %2608 = vmatprep.subr.bf16.mxu1 %v2893_v15 }
 0x238   :  { %2609 = vmatpush3.bf16.msra.mxu1 %v2798_v0 }
 0x239   :  { %2622 = vmatprep.subr.bf16.mxu1 %v2893_v15 }
 0x23b   :  { %2611 = vmatmul.mubr.msk.bf16.vlgmr.msra.gmra.mrb[12].mxu1 %vm93_vm0, %v3083_v36 }
 0x23c   :  { %2623 = vmatpush3.bf16.msra.mxu1 %v2799_v1  ;;  %2626 = vmatprep.mubr.msk.bf16.mxu1 %vm2894_vm1, %v2893_v15 }
 0x23d   :  { %2624 = vmatprep.subr.bf16.mxu1 %v2893_v15 }
 0x240   :  { %2625 = vmatpush3.bf16.msra.mxu1 %v2800_v2 }
 0x241   :  { %2636 = vmatprep.subr.bf16.mxu1 %v2893_v15 }
 0x243   :  { %2627 = vmatmul.mubr.msk.bf16.vlgmr.msra.gmra.mrb[16].mxu1 %vm93_vm0, %v3083_v36 }
 0x244   :  { %2638 = vmatprep.mubr.msk.bf16.mxu1 %vm2894_vm1, %v2893_v15 }
 0x306   :  { %v379_v3 = vpop.f32.mrb[8].mxu1 }
 0x307   :  { %v386_v5 = vmul.f32 0.25, %v379_v3  ;;  %v2598_v6 = vpop.f32.mrb[9].mxu1 }
 0x308   :  { %v382_v7 = vpop.f32.mrb[10].mxu1 }
 0x309   :  { %v387_v9 = vmul.f32 0.25, %v382_v7  ;;  %v2599_v10 = vpop.f32.mrb[11].mxu1  ;;  %v388_v11 = vadd.f32 %v386_v5, %v3144_v4 }
 0x30b   :  { %v390_v12 = vsel %vm338_vm2, %v388_v11, -inf  ;;  %v389_v13 = vadd.f32 %v387_v9, %v3149_v8 }
 0x30c   :  { %391 = vmax.xlane.f32.xlu0 %v390_v12 }
 0x30d   :  { %v393_v14 = vsel %vm338_vm2, %v389_v13, -inf }
 0x30e   :  { %394 = vmax.xlane.f32.xlu1 %v393_v14  ;;  %v519_v17 = vpop.f32.mrb[12].mxu1 }
 0x30f   :  { %v2612_v18 = vpop.f32.mrb[13].mxu1  ;;  %v3158_v20 = vadd.f32 %v2340_v16, %v519_v17 }
 0x310   :  { %v522_v19 = vpop.f32.mrb[14].mxu1 }
 0x311   :  { %v3160_v21 = vadd.f32 %v2340_v16, %v522_v19  ;;  %v2613_v22 = vpop.f32.mrb[15].mxu1 }
 0x313   :  { %v526_v23 = vpack.c.bf16 %v3160_v21, %v3158_v20 }
 0x316   :  { %v653_v25 = vpop.f32.mrb[16].mxu1 }
 0x317   :  { %v2628_v26 = vpop.f32.mrb[17].mxu1  ;;  %v654_v28 = vadd.f32 %v2358_v24, %v653_v25 }
 0x318   :  { %v656_v27 = vpop.f32.mrb[18].mxu1 }
 0x319   :  { %v657_v29 = vadd.f32 %v2358_v24, %v656_v27  ;;  %v2629_v30 = vpop.f32.mrb[19].mxu1 }
 0x31b   :  { %v660_v31 = vpack.c.bf16 %v657_v29, %v654_v28 }
 0x31d   :  { %2637 = vmatpush3.bf16.msra.mxu1 %v660_v31 }
 0x31e   :  { %2648 = vmatprep.subr.bf16.mxu1 %v2893_v15 }
 0x399   :  { %v392_v32 = vpop.xlane.xlu0 %391 }
 0x39a   :  { %v396_v35 = vsub.f32 %v388_v11, %v392_v32  ;;  %v2803_v32 = vld [vmem:[%s3568_s1] sm:$0xff]  }
 0x39b   :  { %v395_v37 = vpop.xlane.xlu1 %394 }
 0x39c   :  { %v398_v38 = vmul.f32 1.442695, %v396_v35  ;;  %v397_v39 = vsub.f32 %v389_v13, %v395_v37  ;;  %v2804_v37 = vld [vmem:[%s3568_s1 + $0x8] sm:$0xff]  }
 0x39e   :  { %2835 = vpow2.f32 %v398_v38  ;;  %v400_v40 = vmul.f32 1.442695, %v397_v39 }
 0x3a0   :  { %2837 = vpow2.f32 %v400_v40 }
 0x3a8   :  { %v2836_v41 = vpop.eup %2835 }
 0x3a9   :  { %v402_v42 = vsel %vm338_vm2, %v2836_v41, 0.0 }
 0x3aa   :  { %v2838_v43 = vpop.eup %2837  ;;  %403 = vadd.xlane.f32.xlu0 %v402_v42 }
 0x3ab   :  { %v405_v44 = vsel %vm338_vm2, %v2838_v43, 0.0 }
 0x3ac   :  { %406 = vadd.xlane.f32.xlu1 %v405_v44 }
 0x437   :  { %v404_v45 = vpop.xlane.xlu0 %403 }
 0x438   :  { %2839 = vrcp.f32 %v404_v45 }
 0x439   :  { %v407_v46 = vpop.xlane.xlu1 %406 }
 0x43a   :  { %2841 = vrcp.f32 %v407_v46 }
 0x442   :  { %v2840_v47 = vpop.eup %2839 }
 0x443   :  { %v410_v49 = vmul.f32 %v2840_v47, %v2836_v41 }
 0x444   :  { %v2842_v48 = vpop.eup %2841 }
 0x445   :  { %v411_v50 = vmul.f32 %v2842_v48, %v2838_v43  ;;  %v2370_v48 = vld [vmem:[%s3569_s3] ss:$0 sm:$0xff] }
 0x447   :  { %v412_v52 = vpack.c.bf16 %v411_v50, %v410_v49 }
 0x449   :  { %2603 = vmatmul.mubr.msk.bf16.vlgmr.msra.gmra.mrb[4].mxu0 %vm338_vm2, %v412_v52 }
 0x44a   :  { %2615 = vmatpush3.bf16.msra.mxu0 %v2801_v51  ;;  %2618 = vmatprep.mubr.msk.bf16.mxu0 %vm2894_vm1, %v2893_v15 }
 0x44b   :  { %2616 = vmatprep.subr.bf16.mxu0 %v2893_v15 }
 0x44e   :  { %2617 = vmatpush3.bf16.msra.mxu0 %v2802_v53 }
 0x44f   :  { %2630 = vmatprep.subr.bf16.mxu0 %v2893_v15 }
 0x451   :  { %2619 = vmatmul.mubr.msk.bf16.vlgmr.msra.gmra.mrb[8].mxu0 %vm93_vm0, %v3083_v36 }
 0x452   :  { %2632 = vmatprep.mubr.msk.bf16.mxu0 %vm2894_vm1, %v2893_v15 }
 0x51c   :  { %v450_v54 = vpop.f32.mrb[4].mxu0 }
 0x51d   :  { %v2604_v55 = vpop.f32.mrb[5].mxu0 }
 0x51e   :  { %v453_v56 = vpop.f32.mrb[6].mxu0 }
 0x51f   :  { %v457_v57 = vpack.c.bf16 %v453_v56, %v450_v54  ;;  %v2605_v58 = vpop.f32.mrb[7].mxu0 }
 0x524   :  { %v586_v60 = vpop.f32.mrb[8].mxu0 }
 0x525   :  { %v2620_v61 = vpop.f32.mrb[9].mxu0  ;;  %v587_v63 = vadd.f32 %v2349_v59, %v586_v60 }
 0x526   :  { %v589_v62 = vpop.f32.mrb[10].mxu0 }
 0x527   :  { %v590_v0 = vadd.f32 %v2349_v59, %v589_v62  ;;  %v2621_v1 = vpop.f32.mrb[11].mxu0 }
 0x529   :  { %v593_v2 = vpack.c.bf16 %v590_v0, %v587_v63 }
 0x52b   :  { %v665_v36 = vsel %vm338_vm2, %v593_v2, 0 }
 0x52c   :  { %2631 = vmatpush3.bf16.xpose.msra.mxu0 %v665_v36 }
 0x52d   :  { %2642 = vmatprep.subr.bf16.mxu0 %v2893_v15 }
 0x533   :  { %2633 = vmatmul.mubr.msk.bf16.vlgmr.msra.gmra.mrb[12].mxu0 %vm338_vm2, %v526_v23 }
 0x534   :  { %2644 = vmatprep.mubr.msk.bf16.mxu0 %vm2894_vm1, %v2893_v15  ;;  %2643 = vmatpush3.bf16.msra.mxu0 %v2804_v37 }
 0x535   :  { %2654 = vmatprep.subr.bf16.mxu0 %v2893_v15 }
 0x606   :  { %v701_v3 = vpop.f32.mrb[12].mxu0 }
 0x607   :  { %v708_v5 = vmul.f32 0.25, %v701_v3  ;;  %v2634_v6 = vpop.f32.mrb[13].mxu0 }
 0x608   :  { %v704_v7 = vpop.f32.mrb[14].mxu0 }
 0x609   :  { %v709_v9 = vmul.f32 0.25, %v704_v7  ;;  %v2635_v10 = vpop.f32.mrb[15].mxu0  ;;  %v710_v11 = vadd.f32 %v708_v5, %v3144_v4  ;;  %v2806_v5 = vld [vmem:[%s3519_s15 + $0x8] sm:$0xff]  }
 0x60b   :  { %v712_v12 = vsel %vm338_vm2, %v710_v11, -inf  ;;  %v711_v13 = vadd.f32 %v709_v9, %v3149_v8 }
 0x60c   :  { %713 = vmax.xlane.f32.xlu0 %v712_v12 }
 0x60d   :  { %v715_v14 = vsel %vm338_vm2, %v711_v13, -inf }
 0x60e   :  { %716 = vmax.xlane.f32.xlu1 %v715_v14  ;;  %v2371_v14 = vld [vmem:[%s3520_s13] ss:$0 sm:$0xff] }
 0x699   :  { %v714_v16 = vpop.xlane.xlu0 %713 }
 0x69a   :  { %v718_v17 = vsub.f32 %v710_v11, %v714_v16 }
 0x69b   :  { %v717_v18 = vpop.xlane.xlu1 %716 }
 0x69c   :  { %v720_v19 = vmul.f32 1.442695, %v718_v17  ;;  %v719_v20 = vsub.f32 %v711_v13, %v717_v18 }
 0x69e   :  { %2843 = vpow2.f32 %v720_v19  ;;  %v722_v21 = vmul.f32 1.442695, %v719_v20  ;;  %v2372_v20 = vld [vmem:[%s3521_s14] ss:$0 sm:$0xff] }
 0x6a0   :  { %2845 = vpow2.f32 %v722_v21 }
 0x6a8   :  { %v2844_v22 = vpop.eup %2843 }
 0x6a9   :  { %v724_v23 = vsel %vm338_vm2, %v2844_v22, 0.0 }
 0x6aa   :  { %v2846_v24 = vpop.eup %2845  ;;  %725 = vadd.xlane.f32.xlu0 %v724_v23 }
 0x6ab   :  { %v727_v25 = vsel %vm338_vm2, %v2846_v24, 0.0 }
 0x6ac   :  { %728 = vadd.xlane.f32.xlu1 %v727_v25  ;;  %v2807_v25 = vld [vmem:[%s3522_s17] sm:$0xff]  }
 0x737   :  { %v726_v26 = vpop.xlane.xlu0 %725 }
 0x738   :  { %2847 = vrcp.f32 %v726_v26  ;;  %v2808_v26 = vld [vmem:[%s3522_s17 + $0x8] sm:$0xff]  }
 0x739   :  { %v729_v27 = vpop.xlane.xlu1 %728 }
 0x73a   :  { %2849 = vrcp.f32 %v729_v27  ;;  %v2809_v27 = vld [vmem:[%s3522_s17 + $0x10] sm:$0xff]  }
 0x742   :  { %v2848_v28 = vpop.eup %2847 }
 0x743   :  { %v732_v30 = vmul.f32 %v2848_v28, %v2844_v22  ;;  %v2810_v28 = vld [vmem:[%s3522_s17 + $0x18] sm:$0xff]  }
 0x744   :  { %v2850_v29 = vpop.eup %2849 }
 0x745   :  { %v733_v31 = vmul.f32 %v2850_v29, %v2846_v24  ;;  %v2373_v29 = vld [vmem:[%s3523_s16] ss:$0 sm:$0xff] }
 0x747   :  { %v734_v35 = vpack.c.bf16 %v733_v31, %v732_v30 }
 0x749   :  { %2639 = vmatmul.mubr.msk.bf16.vlgmr.msra.gmra.mrb[20].mxu1 %vm338_vm2, %v734_v35 }
 0x74a   :  { %2649 = vmatpush3.bf16.msra.mxu1 %v2803_v32  ;;  %2650 = vmatprep.mubr.msk.bf16.mxu1 %vm2894_vm1, %v2893_v15 }
 0x74b   :  { %2662 = vmatprep.subr.bf16.mxu1 %v2893_v15 }
 0x751   :  { %2651 = vmatmul.mubr.msk.bf16.vlgmr.msra.gmra.mrb[24].mxu1 %vm338_vm2, %v457_v57 }
 0x752   :  { %2670 = vmatprep.mubr.msk.bf16.mxu1 %vm2894_vm1, %v2893_v15  ;;  %2663 = vmatpush3.bf16.msra.mxu1 %v2807_v25 }
 0x753   :  { %2664 = vmatprep.subr.bf16.mxu1 %v2893_v15 }
 0x756   :  { %2665 = vmatpush3.bf16.msra.mxu1 %v2808_v26  ;;  %v2383_v26 = vld [vmem:[%s3525_s19] ss:$0 sm:$0xff] }
 0x757   :  { %2666 = vmatprep.subr.bf16.mxu1 %v2893_v15 }
 0x75a   :  { %2667 = vmatpush3.bf16.msra.mxu1 %v2809_v27 }
 0x75b   :  { %2668 = vmatprep.subr.bf16.mxu1 %v2893_v15 }
 0x75e   :  { %2669 = vmatpush3.bf16.msra.mxu1 %v2810_v28 }
 0x75f   :  { %2690 = vmatprep.subr.bf16.mxu1 %v2893_v15 }
 0x81c   :  { %v772_v38 = vpop.f32.mrb[20].mxu1 }
 0x81d   :  { %v2640_v39 = vpop.f32.mrb[21].mxu1 }
 0x81e   :  { %v775_v40 = vpop.f32.mrb[22].mxu1 }
 0x81f   :  { %v779_v41 = vpack.c.bf16 %v775_v40, %v772_v38  ;;  %v2641_v42 = vpop.f32.mrb[23].mxu1 }
 0x821   :  { %2645 = vmatmul.mubr.msk.bf16.vlgmr.msra.gmra.mrb[16].mxu0 %vm338_vm2, %v779_v41 }
 0x822   :  { %2658 = vmatprep.mubr.msk.bf16.mxu0 %vm2894_vm1, %v2893_v15 }
 0x824   :  { %v876_v43 = vpop.f32.mrb[24].mxu1 }
 0x825   :  { %v2652_v44 = vpop.f32.mrb[25].mxu1 }
 0x826   :  { %v879_v45 = vpop.f32.mrb[26].mxu1 }
 0x827   :  { %v2653_v46 = vpop.f32.mrb[27].mxu1 }
 0x8f4   :  { %v826_v47 = vpop.f32.mrb[16].mxu0 }
 0x8f5   :  { %v877_v49 = vadd.f32 %v876_v43, %v826_v47  ;;  %v2646_v50 = vpop.f32.mrb[17].mxu0 }
 0x8f6   :  { %v829_v51 = vpop.f32.mrb[18].mxu0 }
 0x8f7   :  { %v890_v52 = vadd.f32 %v2370_v48, %v877_v49  ;;  %v880_v53 = vadd.f32 %v879_v45, %v829_v51  ;;  %v2647_v54 = vpop.f32.mrb[19].mxu0 }
 0x8f9   :  { %v891_v55 = vadd.f32 %v2370_v48, %v880_v53  ;;  %v892_v56 = vadd.f32 %v890_v52, %v3074_v33 }
 0x8fb   :  { %v896_v57 = vsel %vm93_vm0, %v892_v56, 0.0  ;;  %v893_v58 = vadd.f32 %v891_v55, %v3076_v34  ;;  %v2805_v34 = vld [vmem:[%s3519_s15] sm:$0xff]  }
 0x8fc   :  { %897 = vadd.xlane.f32.xlu0 %v896_v57  ;;  %2655 = vmatpush3.bf16.msra.mxu0 %v2805_v34 }
 0x8fd   :  { %v899_v59 = vsel %vm93_vm0, %v893_v58, 0.0  ;;  %2656 = vmatprep.subr.bf16.mxu0 %v2893_v15 }
 0x8fe   :  { %900 = vadd.xlane.f32.xlu1 %v899_v59 }
 0x900   :  { %2657 = vmatpush3.bf16.msra.mxu0 %v2806_v5 }
 0x901   :  { %2674 = vmatprep.subr.bf16.mxu0 %v2893_v15 }
 0x989   :  { %v898_v60 = vpop.xlane.xlu0 %897 }
 0x98a   :  { %v902_v61 = vmul.f32 0.03125, %v898_v60 }
 0x98b   :  { %v901_v62 = vpop.xlane.xlu1 %900 }
 0x98c   :  { %v904_v63 = vsub.f32 %v892_v56, %v902_v61  ;;  %v903_v0 = vmul.f32 0.03125, %v901_v62 }
 0x98e   :  { %v905_v1 = vsub.f32 %v893_v58, %v903_v0  ;;  %v906_v2 = vmul.f32 %v904_v63, %v904_v63  ;;  %v2377_v58 = vld [vmem:[%s3524_s18] ss:$0 sm:$0xff] }
 0x990   :  { %v908_v36 = vsel %vm93_vm0, %v906_v2, 0.0  ;;  %v907_v3 = vmul.f32 %v905_v1, %v905_v1 }
 0x991   :  { %909 = vadd.xlane.f32.xlu0 %v908_v36 }
 0x992   :  { %v911_v33 = vsel %vm93_vm0, %v907_v3, 0.0 }
 0x993   :  { %912 = vadd.xlane.f32.xlu1 %v911_v33 }
 0xa1e   :  { %v910_v6 = vpop.xlane.xlu0 %909 }
 0xa1f   :  { %v914_v7 = vmul.f32 0.03125, %v910_v6 }
 0xa20   :  { %v913_v9 = vpop.xlane.xlu1 %912 }
 0xa21   :  { %v916_v10 = vadd.f32 1e-12, %v914_v7  ;;  %v915_v11 = vmul.f32 0.03125, %v913_v9 }
 0xa23   :  { %2851 = vrsqrt.f32 %v916_v10  ;;  %v917_v12 = vadd.f32 1e-12, %v915_v11 }
 0xa25   :  { %2853 = vrsqrt.f32 %v917_v12 }
 0xa2d   :  { %v2852_v13 = vpop.eup %2851 }
 0xa2e   :  { %v920_v16 = vmul.f32 %v2852_v13, %v904_v63 }
 0xa2f   :  { %v2854_v17 = vpop.eup %2853 }
 0xa30   :  { %v928_v18 = vmul.f32 %v2371_v14, %v920_v16  ;;  %v921_v19 = vmul.f32 %v2854_v17, %v905_v1  ;;  %v2812_v16 = vld [vmem:[%s3560_s5 + $0x20] sm:$0xff]   ;;  %v2813_v17 = vld [vmem:[%s3559_s0 + $0x28] sm:$0xff]  }
 0xa32   :  { %v929_v21 = vmul.f32 %v2371_v14, %v921_v19  ;;  %v936_v22 = vadd.f32 %v2372_v20, %v928_v18  ;;  %v2811_v14 = vld [vmem:[%s3559_s0 + $0x20] sm:$0xff]   ;;  %v2814_v18 = vld [vmem:[%s3560_s5 + $0x28] sm:$0xff]  }
 0xa34   :  { %v937_v23 = vadd.f32 %v2372_v20, %v929_v21 }
 0xa36   :  { %v938_v24 = vpack.c.bf16 %v937_v23, %v936_v22 }
 0xa38   :  { %2659 = vmatmul.mubr.msk.bf16.vlgmr.msra.gmra.mrb[20].mxu0 %vm93_vm0, %v938_v24 }
 0xa39   :  { %2678 = vmatprep.mubr.msk.bf16.mxu0 %vm2894_vm1, %v2893_v15  ;;  %2675 = vmatpush3.bf16.msra.mxu0 %v2811_v14 }
 0xa3a   :  { %2676 = vmatprep.subr.bf16.mxu0 %v2893_v15 }
 0xa3d   :  { %2677 = vmatpush3.bf16.msra.mxu0 %v2813_v17 }
 0xa3e   :  { %2682 = vmatprep.subr.bf16.mxu0 %v2893_v15 }
 0xb0b   :  { %v999_v30 = vpop.f32.mrb[20].mxu0 }
 0xb0c   :  { %v1000_v31 = vadd.f32 %v2373_v29, %v999_v30  ;;  %v2660_v32 = vpop.f32.mrb[21].mxu0 }
 0xb0d   :  { %v1002_v35 = vpop.f32.mrb[22].mxu0 }
 0xb0e   :  { %v1006_v37 = vmul.f32 %v1000_v31, %v1000_v31  ;;  %v1003_v38 = vadd.f32 %v2373_v29, %v1002_v35  ;;  %v2661_v39 = vpop.f32.mrb[23].mxu0 }
 0xb10   :  { %v1008_v40 = vmul.f32 %v1006_v37, %v1000_v31  ;;  %v1007_v41 = vmul.f32 %v1003_v38, %v1003_v38 }
 0xb12   :  { %v1010_v42 = vmul.f32 0.044715, %v1008_v40  ;;  %v1009_v43 = vmul.f32 %v1007_v41, %v1003_v38  ;;  %v2816_v40 = vld [vmem:[%s3563_s29 + $0x28] sm:$0xff]   ;;  %v2390_v41 = vld [vmem:[%s3564_s8 + $0x2] ss:$0 sm:$0xff] }
 0xb14   :  { %v1012_v44 = vadd.f32 %v1010_v42, %v1000_v31  ;;  %v1011_v45 = vmul.f32 0.044715, %v1009_v43  ;;  %v2408_v43 = vld [vmem:[%s3565_s30 + $0x2] ss:$0 sm:$0xff] }
 0xb16   :  { %v1014_v46 = vmul.f32 0.7978846, %v1012_v44  ;;  %v1013_v47 = vadd.f32 %v1011_v45, %v1003_v38 }
 0xb18   :  { %2855 = vtanh.f32 %v1014_v46  ;;  %v1015_v48 = vmul.f32 0.7978846, %v1013_v47 }
 0xb1a   :  { %2857 = vtanh.f32 %v1015_v48 }
 0xb22   :  { %v2856_v49 = vpop.eup %2855 }
 0xb23   :  { %v1018_v50 = vadd.f32 1.0, %v2856_v49 }
 0xb24   :  { %v2858_v51 = vpop.eup %2857 }
 0xb25   :  { %v1020_v52 = vmul.f32 0.5, %v1018_v50  ;;  %v1019_v53 = vadd.f32 1.0, %v2858_v51 }
 0xb27   :  { %v1021_v54 = vmul.f32 0.5, %v1019_v53  ;;  %v1022_v55 = vmul.f32 %v1020_v52, %v1000_v31  ;;  %v2384_v31 = vld [vmem:[%s3526_s20] ss:$0 sm:$0xff] }
 0xb29   :  { %v1023_v56 = vmul.f32 %v1021_v54, %v1003_v38  ;;  %v2815_v38 = vld [vmem:[%s3563_s29 + $0x20] sm:$0xff]  }
 0xb2b   :  { %v1024_v57 = vpack.c.bf16 %v1023_v56, %v1022_v55 }
 0xb2d   :  { %2671 = vmatmul.mubr.msk.bf16.vlgmr.msra.gmra.mrb[28].mxu1 %vm1064_vm3, %v1024_v57  ;;  %v2399_v57 = vld [vmem:[%s3566_s28 + $0x2] ss:$0 sm:$0xff] }
 0xb2e   :  { %2694 = vmatprep.mubr.msk.bf16.mxu1 %vm2894_vm1, %v2893_v15  ;;  %2691 = vmatpush3.bf16.msra.mxu1 %v2812_v16  ;;  %v2421_v16 = vld [vmem:[%s3564_s8 + $0x3] ss:$0 sm:$0xff] }
 0xb2f   :  { %2692 = vmatprep.subr.bf16.mxu1 %v2893_v15 }
 0xb32   :  { %2693 = vmatpush3.bf16.msra.mxu1 %v2814_v18 }
 0xb33   :  { %2704 = vmatprep.subr.bf16.mxu1 %v2893_v15 }
 0xc00   :  { %v1102_v59 = vpop.f32.mrb[28].mxu1 }
 0xc01   :  { %v1103_v60 = vadd.f32 %v2377_v58, %v1102_v59  ;;  %v2672_v61 = vpop.f32.mrb[29].mxu1 }
 0xc02   :  { %v1105_v62 = vpop.f32.mrb[30].mxu1 }
 0xc03   :  { %v1106_v63 = vadd.f32 %v2377_v58, %v1105_v62  ;;  %v2673_v0 = vpop.f32.mrb[31].mxu1  ;;  %v1109_v1 = vadd.f32 %v1103_v60, %v936_v22 }
 0xc05   :  { %v1113_v2 = vsel %vm93_vm0, %v1109_v1, 0.0  ;;  %v1110_v36 = vadd.f32 %v1106_v63, %v937_v23 }
 0xc06   :  { %1114 = vadd.xlane.f32.xlu0 %v1113_v2  ;;  %v2817_v2 = vld [vmem:[%s3559_s0 + $0x30] sm:$0xff]  }
 0xc07   :  { %v1116_v3 = vsel %vm93_vm0, %v1110_v36, 0.0 }
 0xc08   :  { %1117 = vadd.xlane.f32.xlu1 %v1116_v3  ;;  %v2819_v3 = vld [vmem:[%s3560_s5 + $0x30] sm:$0xff]  }
 0xc93   :  { %v1115_v33 = vpop.xlane.xlu0 %1114 }
 0xc94   :  { %v1119_v34 = vmul.f32 0.03125, %v1115_v33  ;;  %v2820_v33 = vld [vmem:[%s3560_s5 + $0x38] sm:$0xff]  }
 0xc95   :  { %v1118_v5 = vpop.xlane.xlu1 %1117 }
 0xc96   :  { %v1121_v6 = vsub.f32 %v1109_v1, %v1119_v34  ;;  %v1120_v7 = vmul.f32 0.03125, %v1118_v5 }
 0xc98   :  { %v1122_v9 = vsub.f32 %v1110_v36, %v1120_v7  ;;  %v1123_v10 = vmul.f32 %v1121_v6, %v1121_v6  ;;  %v2818_v36 = vld [vmem:[%s3559_s0 + $0x38] sm:$0xff]  }
 0xc9a   :  { %v1125_v11 = vsel %vm93_vm0, %v1123_v10, 0.0  ;;  %v1124_v12 = vmul.f32 %v1122_v9, %v1122_v9 }
 0xc9b   :  { %1126 = vadd.xlane.f32.xlu0 %v1125_v11 }
 0xc9c   :  { %v1128_v13 = vsel %vm93_vm0, %v1124_v12, 0.0 }
 0xc9d   :  { %1129 = vadd.xlane.f32.xlu1 %v1128_v13 }
 0xd28   :  { %v1127_v19 = vpop.xlane.xlu0 %1126 }
 0xd29   :  { %v1131_v20 = vmul.f32 0.03125, %v1127_v19 }
 0xd2a   :  { %v1130_v21 = vpop.xlane.xlu1 %1129 }
 0xd2b   :  { %v1133_v22 = vadd.f32 1e-12, %v1131_v20  ;;  %v1132_v23 = vmul.f32 0.03125, %v1130_v21 }
 0xd2d   :  { %2859 = vrsqrt.f32 %v1133_v22  ;;  %v1134_v24 = vadd.f32 1e-12, %v1132_v23 }
 0xd2f   :  { %2861 = vrsqrt.f32 %v1134_v24  ;;  %v2439_v24 = vld [vmem:[%s3565_s30 + $0x3] ss:$0 sm:$0xff] }
 0xd37   :  { %v2860_v25 = vpop.eup %2859 }
 0xd38   :  { %v1137_v27 = vmul.f32 %v2860_v25, %v1121_v6 }
 0xd39   :  { %v2862_v28 = vpop.eup %2861 }
 0xd3a   :  { %v1145_v29 = vmul.f32 %v2383_v26, %v1137_v27  ;;  %v1138_v30 = vmul.f32 %v2862_v28, %v1122_v9 }
 0xd3c   :  { %v1146_v32 = vmul.f32 %v2383_v26, %v1138_v30  ;;  %v3293_v35 = vadd.f32 %v2384_v31, %v1145_v29 }
 0xd3e   :  { %v3295_v37 = vadd.f32 %v2384_v31, %v1146_v32 }
 0xd40   :  { %v3302_v39 = vpack.c.bf16 %v3295_v37, %v3293_v35 }
 0xd42   :  { %2679 = vmatmul.mubr.msk.bf16.vlgmr.msra.gmra.mrb[24].mxu0 %vm93_vm0, %v3302_v39  ;;  %2695 = vmatmul.mubr.msk.bf16.vlgmr.msra.gmra.mrb[32].mxu1 %vm93_vm0, %v3302_v39 }
 0xd43   :  { %2683 = vmatpush3.bf16.msra.mxu0 %v2815_v38  ;;  %2686 = vmatprep.mubr.msk.bf16.mxu0 %vm2894_vm1, %v2893_v15 }
 0xd44   :  { %2684 = vmatprep.subr.bf16.mxu0 %v2893_v15  ;;  %2706 = vmatprep.mubr.msk.bf16.mxu1 %vm2894_vm1, %v2893_v15 }
 0xd47   :  { %2685 = vmatpush3.bf16.msra.mxu0 %v2816_v40 }
 0xd48   :  { %2698 = vmatprep.subr.bf16.mxu0 %v2893_v15 }
 0xd4a   :  { %2687 = vmatmul.mubr.msk.bf16.vlgmr.msra.gmra.mrb[28].mxu0 %vm93_vm0, %v3302_v39 }
 0xd4b   :  { %2700 = vmatprep.mubr.msk.bf16.mxu0 %vm2894_vm1, %v2893_v15 }
 0xe15   :  { %v1218_v42 = vpop.f32.mrb[24].mxu0  ;;  %v1352_v44 = vpop.f32.mrb[32].mxu1 }
 0xe16   :  { %v2680_v45 = vpop.f32.mrb[25].mxu0  ;;  %v2696_v46 = vpop.f32.mrb[33].mxu1  ;;  %v1219_v49 = vadd.f32 %v2390_v41, %v1218_v42  ;;  %v1353_v50 = vadd.f32 %v2408_v43, %v1352_v44 }
 0xe17   :  { %v1221_v47 = vpop.f32.mrb[26].mxu0  ;;  %v1355_v48 = vpop.f32.mrb[34].mxu1 }
 0xe18   :  { %v1222_v51 = vadd.f32 %v2390_v41, %v1221_v47  ;;  %v1356_v52 = vadd.f32 %v2408_v43, %v1355_v48  ;;  %v2681_v53 = vpop.f32.mrb[27].mxu0  ;;  %v2697_v54 = vpop.f32.mrb[35].mxu1 }
 0xe19   :  { %v2821_v54 = vld [vmem:[%s3563_s29 + $0x30] sm:$0xff]  }
 0xe1a   :  { %v1225_v55 = vpack.c.bf16 %v1222_v51, %v1219_v49  ;;  %v1359_v56 = vpack.c.bf16 %v1356_v52, %v1353_v50 }
 0xe1c   :  { %2705 = vmatpush3.bf16.msra.mxu1 %v1359_v56  ;;  %v2822_v56 = vld [vmem:[%s3563_s29 + $0x38] sm:$0xff]  }
 0xe1d   :  { %v1285_v58 = vpop.f32.mrb[28].mxu0  ;;  %2718 = vmatprep.subr.bf16.mxu1 %v2893_v15 }
 0xe1e   :  { %v2688_v59 = vpop.f32.mrb[29].mxu0  ;;  %v1286_v61 = vadd.f32 %v2399_v57, %v1285_v58 }
 0xe1f   :  { %v1288_v60 = vpop.f32.mrb[30].mxu0 }
 0xe20   :  { %v1289_v62 = vadd.f32 %v2399_v57, %v1288_v60  ;;  %v2689_v63 = vpop.f32.mrb[31].mxu0 }
 0xe22   :  { %v1292_v0 = vpack.c.bf16 %v1289_v62, %v1286_v61  ;;  %v2430_v62 = vld [vmem:[%s3566_s28 + $0x3] ss:$0 sm:$0xff] }
 0xe24   :  { %v1364_v1 = vsel %vm338_vm2, %v1292_v0, 0 }
 0xe25   :  { %2699 = vmatpush3.bf16.xpose.msra.mxu0 %v1364_v1 }
 0xe26   :  { %2710 = vmatprep.subr.bf16.mxu0 %v2893_v15 }
 0xe2c   :  { %2701 = vmatmul.mubr.msk.bf16.vlgmr.msra.gmra.mrb[32].mxu0 %vm338_vm2, %v1225_v55 }
 0xe2d   :  { %2711 = vmatpush3.bf16.msra.mxu0 %v2817_v2  ;;  %2714 = vmatprep.mubr.msk.bf16.mxu0 %vm2894_vm1, %v2893_v15 }
 0xe2e   :  { %2712 = vmatprep.subr.bf16.mxu0 %v2893_v15 }
 0xe31   :  { %2713 = vmatpush3.bf16.msra.mxu0 %v2818_v36 }
 0xe32   :  { %2726 = vmatprep.subr.bf16.mxu0 %v2893_v15 }
 0xe34   :  { %2715 = vmatmul.mubr.msk.bf16.vlgmr.msra.gmra.mrb[36].mxu0 %vm93_vm0, %v3302_v39 }
 0xe35   :  { %2727 = vmatpush3.bf16.msra.mxu0 %v2819_v3  ;;  %2730 = vmatprep.mubr.msk.bf16.mxu0 %vm2894_vm1, %v2893_v15 }
 0xe36   :  { %2728 = vmatprep.subr.bf16.mxu0 %v2893_v15 }
 0xe39   :  { %2729 = vmatpush3.bf16.msra.mxu0 %v2820_v33 }
 0xe3a   :  { %2740 = vmatprep.subr.bf16.mxu0 %v2893_v15 }
 0xe3c   :  { %2731 = vmatmul.mubr.msk.bf16.vlgmr.msra.gmra.mrb[40].mxu0 %vm93_vm0, %v3302_v39 }
 0xe3d   :  { %2742 = vmatprep.mubr.msk.bf16.mxu0 %vm2894_vm1, %v2893_v15 }
 0xeff   :  { %v1400_v34 = vpop.f32.mrb[32].mxu0 }
 0xf00   :  { %v1407_v5 = vmul.f32 0.25, %v1400_v34  ;;  %v2702_v6 = vpop.f32.mrb[33].mxu0 }
 0xf01   :  { %v1403_v7 = vpop.f32.mrb[34].mxu0 }
 0xf02   :  { %v1408_v9 = vmul.f32 0.25, %v1403_v7  ;;  %v2703_v10 = vpop.f32.mrb[35].mxu0  ;;  %v1409_v11 = vadd.f32 %v1407_v5, %v3144_v4 }
 0xf04   :  { %v1411_v12 = vsel %vm338_vm2, %v1409_v11, -inf  ;;  %v1410_v13 = vadd.f32 %v1408_v9, %v3149_v8 }
 0xf05   :  { %1412 = vmax.xlane.f32.xlu0 %v1411_v12 }
 0xf06   :  { %v1414_v14 = vsel %vm338_vm2, %v1410_v13, -inf }
 0xf07   :  { %1415 = vmax.xlane.f32.xlu1 %v1414_v14  ;;  %v1541_v17 = vpop.f32.mrb[36].mxu0 }
 0xf08   :  { %v2716_v18 = vpop.f32.mrb[37].mxu0  ;;  %v3367_v20 = vadd.f32 %v2421_v16, %v1541_v17 }
 0xf09   :  { %v1544_v19 = vpop.f32.mrb[38].mxu0 }
 0xf0a   :  { %v3369_v21 = vadd.f32 %v2421_v16, %v1544_v19  ;;  %v2717_v22 = vpop.f32.mrb[39].mxu0 }
 0xf0c   :  { %v1548_v23 = vpack.c.bf16 %v3369_v21, %v3367_v20 }
 0xf0f   :  { %v1675_v25 = vpop.f32.mrb[40].mxu0 }
 0xf10   :  { %v2732_v26 = vpop.f32.mrb[41].mxu0  ;;  %v1676_v28 = vadd.f32 %v2439_v24, %v1675_v25 }
 0xf11   :  { %v1678_v27 = vpop.f32.mrb[42].mxu0 }
 0xf12   :  { %v1679_v29 = vadd.f32 %v2439_v24, %v1678_v27  ;;  %v2733_v30 = vpop.f32.mrb[43].mxu0 }
 0xf13   :  { %v2823_v30 = vld [vmem:[%s3568_s1 + $0x10] sm:$0xff]  }
 0xf14   :  { %v1682_v31 = vpack.c.bf16 %v1679_v29, %v1676_v28 }
 0xf16   :  { %2741 = vmatpush3.bf16.msra.mxu0 %v1682_v31 }
 0xf17   :  { %2752 = vmatprep.subr.bf16.mxu0 %v2893_v15 }
 0xf92   :  { %v1413_v32 = vpop.xlane.xlu0 %1412 }
 0xf93   :  { %v1417_v38 = vsub.f32 %v1409_v11, %v1413_v32  ;;  %v2824_v32 = vld [vmem:[%s3568_s1 + $0x18] sm:$0xff]  }
 0xf94   :  { %v1416_v40 = vpop.xlane.xlu1 %1415 }
 0xf95   :  { %v1419_v41 = vmul.f32 1.442695, %v1417_v38  ;;  %v1418_v42 = vsub.f32 %v1410_v13, %v1416_v40 }
 0xf97   :  { %2863 = vpow2.f32 %v1419_v41  ;;  %v1421_v43 = vmul.f32 1.442695, %v1418_v42 }
 0xf99   :  { %2865 = vpow2.f32 %v1421_v43 }
 0xfa1   :  { %v2864_v44 = vpop.eup %2863 }
 0xfa2   :  { %v1423_v45 = vsel %vm338_vm2, %v2864_v44, 0.0 }
 0xfa3   :  { %v2866_v46 = vpop.eup %2865  ;;  %1424 = vadd.xlane.f32.xlu0 %v1423_v45 }
 0xfa4   :  { %v1426_v47 = vsel %vm338_vm2, %v2866_v46, 0.0 }
 0xfa5   :  { %1427 = vadd.xlane.f32.xlu1 %v1426_v47 }
0x1030   :  { %v1425_v48 = vpop.xlane.xlu0 %1424 }
0x1031   :  { %2867 = vrcp.f32 %v1425_v48 }
0x1032   :  { %v1428_v49 = vpop.xlane.xlu1 %1427 }
0x1033   :  { %2869 = vrcp.f32 %v1428_v49  ;;  %v2452_v49 = vld [vmem:[%s3569_s3 + $0x1] ss:$0 sm:$0xff] }
0x103b   :  { %v2868_v50 = vpop.eup %2867 }
0x103c   :  { %v1431_v52 = vmul.f32 %v2868_v50, %v2864_v44 }
0x103d   :  { %v2870_v51 = vpop.eup %2869 }
0x103e   :  { %v1432_v53 = vmul.f32 %v2870_v51, %v2866_v46 }
0x1040   :  { %v1433_v55 = vpack.c.bf16 %v1432_v53, %v1431_v52 }
0x1042   :  { %2707 = vmatmul.mubr.msk.bf16.vlgmr.msra.gmra.mrb[36].mxu1 %vm338_vm2, %v1433_v55 }
0x1043   :  { %2719 = vmatpush3.bf16.msra.mxu1 %v2821_v54  ;;  %2722 = vmatprep.mubr.msk.bf16.mxu1 %vm2894_vm1, %v2893_v15 }
0x1044   :  { %2720 = vmatprep.subr.bf16.mxu1 %v2893_v15 }
0x1047   :  { %2721 = vmatpush3.bf16.msra.mxu1 %v2822_v56 }
0x1048   :  { %2734 = vmatprep.subr.bf16.mxu1 %v2893_v15 }
0x104a   :  { %2723 = vmatmul.mubr.msk.bf16.vlgmr.msra.gmra.mrb[40].mxu1 %vm93_vm0, %v3302_v39 }
0x104b   :  { %2736 = vmatprep.mubr.msk.bf16.mxu1 %vm2894_vm1, %v2893_v15 }
0x1115   :  { %v1471_v57 = vpop.f32.mrb[36].mxu1 }
0x1116   :  { %v2708_v58 = vpop.f32.mrb[37].mxu1 }
0x1117   :  { %v1474_v59 = vpop.f32.mrb[38].mxu1 }
0x1118   :  { %v1478_v60 = vpack.c.bf16 %v1474_v59, %v1471_v57  ;;  %v2709_v61 = vpop.f32.mrb[39].mxu1 }
0x111d   :  { %v1608_v63 = vpop.f32.mrb[40].mxu1 }
0x111e   :  { %v2724_v0 = vpop.f32.mrb[41].mxu1  ;;  %v1609_v2 = vadd.f32 %v2430_v62, %v1608_v63 }
0x111f   :  { %v1611_v1 = vpop.f32.mrb[42].mxu1 }
0x1120   :  { %v1612_v36 = vadd.f32 %v2430_v62, %v1611_v1  ;;  %v2725_v3 = vpop.f32.mrb[43].mxu1 }
0x1122   :  { %v1615_v33 = vpack.c.bf16 %v1612_v36, %v1609_v2 }
0x1124   :  { %v1687_v39 = vsel %vm338_vm2, %v1615_v33, 0 }
0x1125   :  { %2735 = vmatpush3.bf16.xpose.msra.mxu1 %v1687_v39  ;;  %v2826_v39 = vld [vmem:[%s3519_s15 + $0x18] sm:$0xff]  }
0x1126   :  { %2746 = vmatprep.subr.bf16.mxu1 %v2893_v15 }
0x112c   :  { %2737 = vmatmul.mubr.msk.bf16.vlgmr.msra.gmra.mrb[44].mxu1 %vm338_vm2, %v1548_v23 }
0x112d   :  { %2748 = vmatprep.mubr.msk.bf16.mxu1 %vm2894_vm1, %v2893_v15  ;;  %2747 = vmatpush3.bf16.msra.mxu1 %v2824_v32 }
0x112e   :  { %2758 = vmatprep.subr.bf16.mxu1 %v2893_v15 }
0x11ff   :  { %v1723_v34 = vpop.f32.mrb[44].mxu1 }
0x1200   :  { %v1730_v5 = vmul.f32 0.25, %v1723_v34  ;;  %v2738_v6 = vpop.f32.mrb[45].mxu1 }
0x1201   :  { %v1726_v7 = vpop.f32.mrb[46].mxu1 }
0x1202   :  { %v1731_v9 = vmul.f32 0.25, %v1726_v7  ;;  %v2739_v10 = vpop.f32.mrb[47].mxu1  ;;  %v1732_v11 = vadd.f32 %v1730_v5, %v3144_v4 }
0x1204   :  { %v1734_v12 = vsel %vm338_vm2, %v1732_v11, -inf  ;;  %v1733_v13 = vadd.f32 %v1731_v9, %v3149_v8 }
0x1205   :  { %1735 = vmax.xlane.f32.xlu0 %v1734_v12  ;;  %v2455_v12 = vld [vmem:[%s3520_s13 + $0x1] ss:$0 sm:$0xff] }
0x1206   :  { %v1737_v14 = vsel %vm338_vm2, %v1733_v13, -inf }
0x1207   :  { %1738 = vmax.xlane.f32.xlu1 %v1737_v14 }
0x1292   :  { %v1736_v16 = vpop.xlane.xlu0 %1735 }
0x1293   :  { %v1740_v17 = vsub.f32 %v1732_v11, %v1736_v16 }
0x1294   :  { %v1739_v18 = vpop.xlane.xlu1 %1738 }
0x1295   :  { %v1742_v19 = vmul.f32 1.442695, %v1740_v17  ;;  %v1741_v20 = vsub.f32 %v1733_v13, %v1739_v18  ;;  %v2456_v18 = vld [vmem:[%s3521_s14 + $0x1] ss:$0 sm:$0xff] }
0x1297   :  { %2871 = vpow2.f32 %v1742_v19  ;;  %v1744_v21 = vmul.f32 1.442695, %v1741_v20 }
0x1299   :  { %2873 = vpow2.f32 %v1744_v21 }
0x12a1   :  { %v2872_v22 = vpop.eup %2871 }
0x12a2   :  { %v1746_v23 = vsel %vm338_vm2, %v2872_v22, 0.0 }
0x12a3   :  { %v2874_v4 = vpop.eup %2873  ;;  %1747 = vadd.xlane.f32.xlu0 %v1746_v23  ;;  %v2827_v23 = vld [vmem:[%s3522_s17 + $0x20] sm:$0xff]  }
0x12a4   :  { %v1749_v24 = vsel %vm338_vm2, %v2874_v4, 0.0 }
0x12a5   :  { %1750 = vadd.xlane.f32.xlu1 %v1749_v24  ;;  %v2829_v24 = vld [vmem:[%s3522_s17 + $0x30] sm:$0xff]  }
0x1330   :  { %v1748_v8 = vpop.xlane.xlu0 %1747 }
0x1331   :  { %2875 = vrcp.f32 %v1748_v8  ;;  %v2830_v8 = vld [vmem:[%s3522_s17 + $0x38] sm:$0xff]  }
0x1332   :  { %v1751_v25 = vpop.xlane.xlu1 %1750 }
0x1333   :  { %2877 = vrcp.f32 %v1751_v25  ;;  %v2462_v25 = vld [vmem:[%s3523_s16 + $0x1] ss:$0 sm:$0xff] }
0x133b   :  { %v2876_v26 = vpop.eup %2875 }
0x133c   :  { %v1754_v28 = vmul.f32 %v2876_v26, %v2872_v22 }
0x133d   :  { %v2878_v27 = vpop.eup %2877 }
0x133e   :  { %v1755_v29 = vmul.f32 %v2878_v27, %v2874_v4  ;;  %v2828_v4 = vld [vmem:[%s3522_s17 + $0x28] sm:$0xff]  }
0x1340   :  { %v1756_v31 = vpack.c.bf16 %v1755_v29, %v1754_v28 }
0x1342   :  { %2743 = vmatmul.mubr.msk.bf16.vlgmr.msra.gmra.mrb[44].mxu0 %vm338_vm2, %v1756_v31 }
0x1343   :  { %2753 = vmatpush3.bf16.msra.mxu0 %v2823_v30  ;;  %2754 = vmatprep.mubr.msk.bf16.mxu0 %vm2894_vm1, %v2893_v15 }
0x1344   :  { %2766 = vmatprep.subr.bf16.mxu0 %v2893_v15 }
0x134a   :  { %2755 = vmatmul.mubr.msk.bf16.vlgmr.msra.gmra.mrb[48].mxu0 %vm338_vm2, %v1478_v60 }
0x134b   :  { %2774 = vmatprep.mubr.msk.bf16.mxu0 %vm2894_vm1, %v2893_v15  ;;  %2767 = vmatpush3.bf16.msra.mxu0 %v2827_v23  ;;  %v2484_v23 = vld [vmem:[%s3526_s20 + $0x1] ss:$0 sm:$0xff] }
0x134c   :  { %2768 = vmatprep.subr.bf16.mxu0 %v2893_v15 }
0x134f   :  { %2769 = vmatpush3.bf16.msra.mxu0 %v2828_v4 }
0x1350   :  { %2770 = vmatprep.subr.bf16.mxu0 %v2893_v15 }
0x1353   :  { %2771 = vmatpush3.bf16.msra.mxu0 %v2829_v24 }
0x1354   :  { %2772 = vmatprep.subr.bf16.mxu0 %v2893_v15 }
0x1357   :  { %2773 = vmatpush3.bf16.msra.mxu0 %v2830_v8 }
0x1415   :  { %v1794_v38 = vpop.f32.mrb[44].mxu0 }
0x1416   :  { %v2744_v40 = vpop.f32.mrb[45].mxu0 }
0x1417   :  { %v1797_v41 = vpop.f32.mrb[46].mxu0 }
0x1418   :  { %v1801_v42 = vpack.c.bf16 %v1797_v41, %v1794_v38  ;;  %v2745_v43 = vpop.f32.mrb[47].mxu0 }
0x141a   :  { %2749 = vmatmul.mubr.msk.bf16.vlgmr.msra.gmra.mrb[48].mxu1 %vm338_vm2, %v1801_v42 }
0x141b   :  { %2762 = vmatprep.mubr.msk.bf16.mxu1 %vm2894_vm1, %v2893_v15 }
0x141d   :  { %v1898_v44 = vpop.f32.mrb[48].mxu0 }
0x141e   :  { %v2756_v45 = vpop.f32.mrb[49].mxu0 }
0x141f   :  { %v1901_v46 = vpop.f32.mrb[50].mxu0 }
0x1420   :  { %v2757_v47 = vpop.f32.mrb[51].mxu0 }
0x14ed   :  { %v1848_v48 = vpop.f32.mrb[48].mxu1 }
0x14ee   :  { %v1899_v50 = vadd.f32 %v1898_v44, %v1848_v48  ;;  %v2750_v51 = vpop.f32.mrb[49].mxu1 }
0x14ef   :  { %v1851_v52 = vpop.f32.mrb[50].mxu1 }
0x14f0   :  { %v1913_v53 = vadd.f32 %v2452_v49, %v1899_v50  ;;  %v1902_v54 = vadd.f32 %v1901_v46, %v1851_v52  ;;  %v2751_v55 = vpop.f32.mrb[51].mxu1 }
0x14f2   :  { %v1914_v56 = vadd.f32 %v2452_v49, %v1902_v54  ;;  %v1915_v57 = vadd.f32 %v1913_v53, %v3293_v35 }
0x14f4   :  { %v1921_v58 = vsel %vm93_vm0, %v1915_v57, 0.0  ;;  %v1916_v59 = vadd.f32 %v1914_v56, %v3295_v37  ;;  %v2825_v37 = vld [vmem:[%s3519_s15 + $0x10] sm:$0xff]   ;;  %v2475_v56 = vld [vmem:[%s3524_s18 + $0x1] ss:$0 sm:$0xff] }
0x14f5   :  { %1922 = vadd.xlane.f32.xlu0 %v1921_v58  ;;  %2759 = vmatpush3.bf16.msra.mxu1 %v2825_v37 }
0x14f6   :  { %v1924_v60 = vsel %vm93_vm0, %v1916_v59, 0.0  ;;  %2760 = vmatprep.subr.bf16.mxu1 %v2893_v15 }
0x14f7   :  { %1925 = vadd.xlane.f32.xlu1 %v1924_v60 }
0x14f9   :  { %2761 = vmatpush3.bf16.msra.mxu1 %v2826_v39 }
0x1582   :  { %v1923_v61 = vpop.xlane.xlu0 %1922 }
0x1583   :  { %v1927_v62 = vmul.f32 0.03125, %v1923_v61 }
0x1584   :  { %v1926_v63 = vpop.xlane.xlu1 %1925 }
0x1585   :  { %v1929_v0 = vsub.f32 %v1915_v57, %v1927_v62  ;;  %v1928_v1 = vmul.f32 0.03125, %v1926_v63 }
0x1587   :  { %v1930_v2 = vsub.f32 %v1916_v59, %v1928_v1  ;;  %v1931_v36 = vmul.f32 %v1929_v0, %v1929_v0 }
0x1589   :  { %v1933_v3 = vsel %vm93_vm0, %v1931_v36, 0.0  ;;  %v1932_v33 = vmul.f32 %v1930_v2, %v1930_v2 }
0x158a   :  { %1934 = vadd.xlane.f32.xlu0 %v1933_v3 }
0x158b   :  { %v1936_v35 = vsel %vm93_vm0, %v1932_v33, 0.0 }
0x158c   :  { %1937 = vadd.xlane.f32.xlu1 %v1936_v35 }
0x1617   :  { %v1935_v34 = vpop.xlane.xlu0 %1934 }
0x1618   :  { %v1939_v5 = vmul.f32 0.03125, %v1935_v34 }
0x1619   :  { %v1938_v6 = vpop.xlane.xlu1 %1937 }
0x161a   :  { %v1941_v7 = vadd.f32 1e-12, %v1939_v5  ;;  %v1940_v9 = vmul.f32 0.03125, %v1938_v6 }
0x161c   :  { %2879 = vrsqrt.f32 %v1941_v7  ;;  %v1942_v10 = vadd.f32 1e-12, %v1940_v9  ;;  %v2895_v9 = vmov 0.0|0.0  }
0x161d   :  { %2785 = vmatprep.subr.bf16.mxu1 %v2895_v9 }
0x161e   :  { %2881 = vrsqrt.f32 %v1942_v10 }
0x1626   :  { %v2880_v11 = vpop.eup %2879 }
0x1627   :  { %v1945_v13 = vmul.f32 %v2880_v11, %v1929_v0 }
0x1628   :  { %v2882_v14 = vpop.eup %2881 }
0x1629   :  { %v1953_v16 = vmul.f32 %v2455_v12, %v1945_v13  ;;  %v1946_v17 = vmul.f32 %v2882_v14, %v1930_v2 }
0x162b   :  { %v1954_v19 = vmul.f32 %v2455_v12, %v1946_v17  ;;  %v1961_v20 = vadd.f32 %v2456_v18, %v1953_v16 }
0x162d   :  { %v1962_v21 = vadd.f32 %v2456_v18, %v1954_v19  ;;  %v2483_v18 = vld [vmem:[%s3525_s19 + $0x1] ss:$0 sm:$0xff] }
0x162f   :  { %v1963_v22 = vpack.c.bf16 %v1962_v21, %v1961_v20 }
0x1631   :  { %2763 = vmatmul.mubr.msk.bf16.vlgmr.msra.gmra.mrb[52].mxu1 %vm93_vm0, %v1963_v22 }
0x1632   :  { %2782 = vmatprep.mubr.msk.f32.mxu1 %vm2894_vm1, %v2893_v15 }
0x1704   :  { %v2026_v26 = vpop.f32.mrb[52].mxu1 }
0x1705   :  { %v2027_v27 = vadd.f32 %v2462_v25, %v2026_v26  ;;  %v2764_v28 = vpop.f32.mrb[53].mxu1  ;;  %v2185_v26 = vld [vmem:[%s3527_s2] sm:$0x3] }
0x1706   :  { %v2029_v29 = vpop.f32.mrb[54].mxu1  ;;  %v2267_v28 = vld [vmem:[%s3529_s24] sm:$0x1] }
0x1707   :  { %v2033_v30 = vmul.f32 %v2027_v27, %v2027_v27  ;;  %v2030_v31 = vadd.f32 %v2462_v25, %v2029_v29  ;;  %v2765_v32 = vpop.f32.mrb[55].mxu1  ;;  %v2268_v29 = vadd.f32 1e-05, %v2267_v28 }
0x1709   :  { %v2035_v38 = vmul.f32 %v2033_v30, %v2027_v27  ;;  %v2034_v40 = vmul.f32 %v2030_v31, %v2030_v31  ;;  %v2271_v30 = vlaneseq }
0x170b   :  { %v2037_v41 = vmul.f32 0.044715, %v2035_v38  ;;  %v2036_v15 = vmul.f32 %v2034_v40, %v2030_v31  ;;  %v2486_v40 = vld [vmem:[%s3530_s23] ss:$0 sm:$0xff] }
0x170d   :  { %v2039_v42 = vadd.f32 %v2037_v41, %v2027_v27  ;;  %v2038_v43 = vmul.f32 0.044715, %v2036_v15 }
0x170f   :  { %v2041_v44 = vmul.f32 0.7978846, %v2039_v42  ;;  %v2040_v45 = vadd.f32 %v2038_v43, %v2030_v31 }
0x1711   :  { %2883 = vtanh.f32 %v2041_v44  ;;  %v2042_v46 = vmul.f32 0.7978846, %v2040_v45  ;;  %v2487_v44 = vld [vmem:[%s3531_s21] ss:$0 sm:$0xff] }
0x1713   :  { %2885 = vtanh.f32 %v2042_v46  ;;  %v2488_v46 = vld [vmem:[%s3532_s22] ss:$0 sm:$0xff] }
0x171b   :  { %v2884_v47 = vpop.eup %2883 }
0x171c   :  { %v2045_v48 = vadd.f32 1.0, %v2884_v47 }
0x171d   :  { %v2886_v49 = vpop.eup %2885 }
0x171e   :  { %v2047_v50 = vmul.f32 0.5, %v2045_v48  ;;  %v2046_v51 = vadd.f32 1.0, %v2886_v49  ;;  %v2489_v48 = vld [vmem:[%s3533_s25] ss:$0 sm:$0xff] }
0x1720   :  { %v2048_v52 = vmul.f32 0.5, %v2046_v51  ;;  %v2049_v53 = vmul.f32 %v2047_v50, %v2027_v27  ;;  %v32_v27 = vstv %s3528_s26 }
0x1721   :  { %33 = vst [vmem:[#allocation2] sm:$0x1] %v32_v27 }
0x1722   :  { %v2050_v54 = vmul.f32 %v2048_v52, %v2030_v31  ;;  %v2272_v31 = vshrl.u32 %v2271_v30, 7 }
0x1724   :  { %v2051_v55 = vpack.c.bf16 %v2050_v54, %v2049_v53  ;;  %v2273_v32 = vsub.s32 0, %v2272_v31 }
0x1726   :  { %2775 = vmatmul.mubr.msk.bf16.vlgmr.msra.gmra.mrb[52].mxu0 %vm1064_vm3, %v2051_v55 }
0x1728   :  { %v2490_v52 = vld [vmem:[#allocation2] ss:$0 sm:$0xff] }
0x17f9   :  { %v2130_v57 = vpop.f32.mrb[52].mxu0 }
0x17fa   :  { %v2131_v58 = vadd.f32 %v2475_v56, %v2130_v57  ;;  %v2776_v59 = vpop.f32.mrb[53].mxu0 }
0x17fb   :  { %v2133_v60 = vpop.f32.mrb[54].mxu0 }
0x17fc   :  { %v2134_v61 = vadd.f32 %v2475_v56, %v2133_v60  ;;  %v2777_v62 = vpop.f32.mrb[55].mxu0  ;;  %v2137_v63 = vadd.f32 %v2131_v58, %v1961_v20 }
0x17fe   :  { %v2143_v0 = vsel %vm93_vm0, %v2137_v63, 0.0  ;;  %v2138_v1 = vadd.f32 %v2134_v61, %v1962_v21 }
0x17ff   :  { %2144 = vadd.xlane.f32.xlu0 %v2143_v0 }
0x1800   :  { %v2146_v2 = vsel %vm93_vm0, %v2138_v1, 0.0 }
0x1801   :  { %2147 = vadd.xlane.f32.xlu1 %v2146_v2 }
0x188c   :  { %v2145_v36 = vpop.xlane.xlu0 %2144 }
0x188d   :  { %v2149_v3 = vmul.f32 0.03125, %v2145_v36 }
0x188e   :  { %v2148_v33 = vpop.xlane.xlu1 %2147 }
0x188f   :  { %v2151_v35 = vsub.f32 %v2137_v63, %v2149_v3  ;;  %v2150_v37 = vmul.f32 0.03125, %v2148_v33 }
0x1891   :  { %v2152_v39 = vsub.f32 %v2138_v1, %v2150_v37  ;;  %v2153_v34 = vmul.f32 %v2151_v35, %v2151_v35 }
0x1893   :  { %v2155_v5 = vsel %vm93_vm0, %v2153_v34, 0.0  ;;  %v2154_v6 = vmul.f32 %v2152_v39, %v2152_v39 }
0x1894   :  { %2156 = vadd.xlane.f32.xlu0 %v2155_v5 }
0x1895   :  { %v2158_v7 = vsel %vm93_vm0, %v2154_v6, 0.0 }
0x1896   :  { %2159 = vadd.xlane.f32.xlu1 %v2158_v7 }
0x1921   :  { %v2157_v10 = vpop.xlane.xlu0 %2156 }
0x1922   :  { %v2161_v11 = vmul.f32 0.03125, %v2157_v10 }
0x1923   :  { %v2160_v12 = vpop.xlane.xlu1 %2159 }
0x1924   :  { %v2163_v13 = vadd.f32 1e-12, %v2161_v11  ;;  %v2162_v14 = vmul.f32 0.03125, %v2160_v12 }
0x1926   :  { %2887 = vrsqrt.f32 %v2163_v13  ;;  %v2164_v16 = vadd.f32 1e-12, %v2162_v14 }
0x1928   :  { %2889 = vrsqrt.f32 %v2164_v16 }
0x1929   :  { %2891 = vrsqrt.f32 %v2268_v29 }
0x1930   :  { %v2888_v17 = vpop.eup %2887 }
0x1931   :  { %v2167_v19 = vmul.f32 %v2888_v17, %v2151_v35 }
0x1932   :  { %v2890_v20 = vpop.eup %2889 }
0x1933   :  { %v2168_v21 = vmul.f32 %v2890_v20, %v2152_v39  ;;  %v2175_v22 = vmul.f32 %v2483_v18, %v2167_v19  ;;  %v2892_v38 = vpop.eup %2891 }
0x1934   :  { %v2274_v41 = vrot.slane %v2892_v38, %v2273_v32 }
0x1935   :  { %v2176_v4 = vmul.f32 %v2483_v18, %v2168_v21  ;;  %v2183_v24 = vadd.f32 %v2484_v23, %v2175_v22 }
0x1937   :  { %v2184_v8 = vadd.f32 %v2484_v23, %v2176_v4 }
0x1939   :  { %v2786_v25 = vpack.c.bf16 %v2184_v8, %v2183_v24 }
0x193b   :  { %2787 = vmatpush3.bf16.msra.mxu1 %v2786_v25 }
0x193e   :  { %2783 = vmatmul.mubr.msk.f32.vlgmr.msra.gmra.mrb[56].mxu1 %vm338_vm2, %v2185_v26 }
0x1a11   :  { %v2255_v15 = vpop.f32.mrb[56].mxu1 }
0x1a12   :  { %v2266_v42 = vsub.f32 %v2255_v15, %v2486_v40  ;;  %v2784_v43 = vpop.f32.mrb[57].mxu1 }
0x1a14   :  { %v2276_v45 = vmul.f32 %v2274_v41, %v2266_v42 }
0x1a16   :  { %v2284_v47 = vmul.f32 %v2487_v44, %v2276_v45 }
0x1a18   :  { %v2292_v49 = vadd.f32 %v2488_v46, %v2284_v47 }
0x1a1a   :  { %v2300_v50 = vmul.f32 %v2489_v48, %v2292_v49 }
0x1a1c   :  { %v2302_v51 = vsel %vm2301_vm4, %v2300_v50, 0.0 }
0x1a1d   :  { %2303 = vadd.xlane.f32.xlu0 %v2302_v51 }
0x1aaa   :  { %v2304_v53 = vpop.xlane.xlu0 %2303 }
0x1aab   :  { %v2312_v54 = vadd.f32 %v2490_v52, %v2304_v53 }
0x1aad   :  { %2314 = vst.msk [vmem:[%s3570_s27] sm:$0x3] %vm2313_vm5, %v2312_v54 }

</bundles_post_ra>
